<compile_context>
chip_gen: v6e
topology: v6e:2x2x1
jax: 0.10.0
libtpu: 0.0.40
codegen_flags: <defaults>
</compile_context>

<pallas_src>
import functools

import jax
import jax.numpy as jnp
from jax.experimental import pallas as pl
from jax.experimental.pallas import tpu as pltpu


def _residual_cbam_kernel(x_ref, bn1s_ref, bn1b_ref, w1_ref,
                          bn2s_ref, bn2b_ref, w2_ref, b2_ref,
                          wca1_ref, wca2_ref, ws_ref, o_ref, *, seq_len):
    L = seq_len
    M, C = x_ref.shape                                  # M = bt * L (static)
    bt = M // L
    mm_dtype = w1_ref.dtype                             # matmul operand dtype

    # Row position within its own sample (the slab holds bt contiguous samples).
    li = jax.lax.broadcasted_iota(jnp.int32, (M, 1), 0) % L
    not_first = li != 0            # row l-1 exists inside the same sample
    not_last = li != (L - 1)       # row l+1 exists inside the same sample

    def conv3(h, w_ref):
        # k=3, pad=1 conv: 3 MXU matmuls; shifted rows come from the XLU roll,
        # cross-sample leakage (and slab wrap-around) is masked to zero.
        prev = jnp.where(not_first, pltpu.roll(h, shift=1, axis=0), 0.0)
        nxt = jnp.where(not_last, pltpu.roll(h, shift=M - 1, axis=0), 0.0)
        y = jnp.dot(prev.astype(mm_dtype), w_ref[0],
                    preferred_element_type=jnp.float32)
        y = y + jnp.dot(h.astype(mm_dtype), w_ref[1],
                        preferred_element_type=jnp.float32)
        y = y + jnp.dot(nxt.astype(mm_dtype), w_ref[2],
                        preferred_element_type=jnp.float32)
        return y

    # --- pre-act block 1: BN -> ReLU -> Conv(k=3) (bias folded into bn2) ---
    h = jnp.maximum(x_ref[...].astype(jnp.float32) * bn1s_ref[...]
                    + bn1b_ref[...], 0.0)
    h = conv3(h, w1_ref)

    # --- pre-act block 2: BN (includes conv1 bias) -> ReLU -> Conv(k=3)+b ---
    h = jnp.maximum(h * bn2s_ref[...] + bn2b_ref[...], 0.0)
    h = conv3(h, w2_ref) + b2_ref[...]

    # --- CBAM channel attention (all pooled vectors batched into one MLP) ---
    h3 = h.reshape(bt, L, C)
    pooled = jnp.concatenate(
        [jnp.mean(h3, axis=1), jnp.max(h3, axis=1)], axis=0)     # (2*bt, C)
    hid = jnp.maximum(
        jnp.dot(pooled.astype(mm_dtype), wca1_ref[...],
                preferred_element_type=jnp.float32), 0.0)
    z = jnp.dot(hid.astype(mm_dtype), wca2_ref[...],
                preferred_element_type=jnp.float32)              # (2*bt, C)
    c_w = jax.nn.sigmoid(z[:bt] + z[bt:])                        # (bt, C)
    h = (h3 * c_w[:, None, :]).reshape(M, C)

    # --- CBAM spatial attention: k=7, pad=3 conv over [mean_c, max_c] ---
    a_mean = jnp.mean(h, axis=1, keepdims=True)                  # (M, 1)
    a_max = jnp.max(h, axis=1, keepdims=True)                    # (M, 1)
    s = a_mean * ws_ref[0, 3] + a_max * ws_ref[1, 3]             # center tap
    for k in range(7):
        d = k - 3
        if d == 0:
            continue
        a_s = pltpu.roll(a_mean, shift=(-d) % M, axis=0)         # a_mean[l+d]
        m_s = pltpu.roll(a_max, shift=(-d) % M, axis=0)
        contrib = a_s * ws_ref[0, k] + m_s * ws_ref[1, k]
        mask = (li >= -d) if d < 0 else (li < L - d)             # in-sample only
        s = s + jnp.where(mask, contrib, 0.0)
    h = h * jax.nn.sigmoid(s)

    # --- residual add (identity skip; x reloaded to keep live range short) ---
    o_ref[...] = (h + x_ref[...].astype(jnp.float32)).astype(o_ref.dtype)


def residual_cbam_preact(x_ncl, params, *, compute_dtype=jnp.bfloat16,
                         batch_tile=None):
    """x_ncl: (N, C, L) float32 (PyTorch Conv1d layout). Returns (N, C, L)."""
    N, C, L = x_ncl.shape
    Cr = max(C // 8, 1)
    eps = 1e-5

    # Channels-last, batch flattened into rows: (N*L, C).
    x_flat = jnp.transpose(x_ncl, (0, 2, 1)).astype(jnp.float32).reshape(N * L, C)

    def bn_affine(p):
        scale = p["gamma"] / jnp.sqrt(p["var"] + eps)
        bias = p["beta"] - p["mean"] * scale
        return (scale.reshape(1, C).astype(jnp.float32),
                bias.reshape(1, C).astype(jnp.float32))

    bn1s, bn1b = bn_affine(params["bn1"])
    bn2s, bn2b = bn_affine(params["bn2"])
    # Fold conv1's bias into bn2's bias: bn2(conv1_raw + b1) = conv1_raw*s2 + (b1*s2 + bias2)
    bn2b = bn2b + params["conv1_b"].reshape(1, C).astype(jnp.float32) * bn2s

    def pack_conv_w(w):  # (Cout, Cin, 3) -> (3, Cin, Cout), tap-major
        return jnp.transpose(w, (2, 1, 0)).astype(compute_dtype)

    w1 = pack_conv_w(params["conv1_w"])
    w2 = pack_conv_w(params["conv2_w"])
    b2 = params["conv2_b"].reshape(1, C).astype(jnp.float32)
    wca1 = params["ca_conv1_w"][:, :, 0].T.astype(compute_dtype)   # (C, Cr)
    wca2 = params["ca_conv2_w"][:, :, 0].T.astype(compute_dtype)   # (Cr, C)
    ws = params["sa_conv_w"][0].astype(jnp.float32)                # (2, 7)

    # --- generation-aware tile selection (VMEM budget + dual-TC friendliness) ---
    try:
        vmem_cap = int(getattr(pltpu.get_tpu_info(), "vmem_capacity_bytes",
                               64 * 1024 * 1024))
    except Exception:
        vmem_cap = 64 * 1024 * 1024                    # conservative (v7x per-TC)
    vmem_limit = int(min(100 * 1024 * 1024, (vmem_cap * 3) // 4))
    # Rough live-VMEM model per grid step: x/out double-buffered (4 f32 slabs)
    # plus ~6 (M, C) f32-equivalent temporaries inside the kernel body.
    bytes_per_row = 10 * C * 4
    rows_cap = max(L, (vmem_limit // 2) // bytes_per_row)

    if batch_tile is None:
        cap = max(1, rows_cap // L)
        if N >= 2:
            cap = min(cap, N // 2)           # keep >= 2 grid steps (v7x dual TC)
        divisors = [d for d in range(1, N + 1) if N % d == 0]
        good = [d for d in divisors if d <= cap and (d * L) % 8 == 0]
        if good:
            bt = max(good)
        else:
            good = [d for d in divisors if (d * L) % 8 == 0]
            bt = min(good) if good else N    # last resort: full-array block
    else:
        bt = batch_tile
    M = bt * L

    def const_spec(shape):
        n = len(shape)
        return pl.BlockSpec(shape, lambda i, _n=n: (0,) * _n)

    out = pl.pallas_call(
        functools.partial(_residual_cbam_kernel, seq_len=L),
        out_shape=jax.ShapeDtypeStruct((N * L, C), jnp.float32),
        grid=(N // bt,),
        in_specs=[
            pl.BlockSpec((M, C), lambda i: (i, 0)),          # x (batch tile)
            const_spec((1, C)), const_spec((1, C)),          # bn1 scale / bias
            const_spec((3, C, C)),                           # conv1 w (tap-major)
            const_spec((1, C)), const_spec((1, C)),          # bn2 scale / bias(+b1)
            const_spec((3, C, C)), const_spec((1, C)),       # conv2 w / b
            const_spec((C, Cr)), const_spec((Cr, C)),        # channel-attn MLP
            pl.BlockSpec(memory_space=pltpu.MemorySpace.SMEM),  # spatial taps
        ],
        out_specs=pl.BlockSpec((M, C), lambda i: (i, 0)),
        compiler_params=pltpu.CompilerParams(
            dimension_semantics=("parallel",),
            vmem_limit_bytes=vmem_limit),
    )(x_flat, bn1s, bn1b, w1, bn2s, bn2b, w2, b2, wca1, wca2, ws)

    return jnp.transpose(out.reshape(N, L, C), (0, 2, 1))


def reference_forward(x, params):
    """Pure-JAX reference matching the PyTorch forward (eval-mode BN)."""
    eps = 1e-5

    def bn(h, p):
        return ((h - p["mean"][None, :, None]) /
                jnp.sqrt(p["var"][None, :, None] + eps) *
                p["gamma"][None, :, None] + p["beta"][None, :, None])

    def conv1d(h, w, b=None, pad=0):
        y = jax.lax.conv_general_dilated(
            h, w, window_strides=(1,), padding=[(pad, pad)],
            dimension_numbers=("NCH", "OIH", "NCH"))
        if b is not None:
            y = y + b[None, :, None]
        return y

    x_skip = x
    h = jnp.maximum(bn(x, params["bn1"]), 0.0)
    h = conv1d(h, params["conv1_w"], params["conv1_b"], pad=1)
    h = jnp.maximum(bn(h, params["bn2"]), 0.0)
    h = conv1d(h, params["conv2_w"], params["conv2_b"], pad=1)

    # CBAM channel attention
    avg = jnp.mean(h, axis=2, keepdims=True)
    mx = jnp.max(h, axis=2, keepdims=True)

    def ca(v):
        t = jnp.maximum(conv1d(v, params["ca_conv1_w"]), 0.0)
        return conv1d(t, params["ca_conv2_w"])

    c_w = jax.nn.sigmoid(ca(avg) + ca(mx))
    h = c_w * h

    # CBAM spatial attention
    a = jnp.mean(h, axis=1, keepdims=True)
    m = jnp.max(h, axis=1, keepdims=True)
    s = jnp.concatenate([a, m], axis=1)
    s_w = jax.nn.sigmoid(conv1d(s, params["sa_conv_w"], pad=3))
    h = s_w * h
    return h + x_skip


def make_params(key, C):
    Cr = max(C // 8, 1)
    ks = jax.random.split(key, 12)
    u = lambda k, shape, lo=-0.5, hi=0.5: jax.random.uniform(
        k, shape, jnp.float32, lo, hi)
    return {
        "bn1": {"gamma": u(ks[0], (C,), 0.5, 1.5), "beta": u(ks[1], (C,)),
                "mean": u(ks[2], (C,)), "var": u(ks[3], (C,), 0.5, 1.5)},
        "conv1_w": u(ks[4], (C, C, 3)), "conv1_b": u(ks[5], (C,)),
        "bn2": {"gamma": u(ks[6], (C,), 0.5, 1.5), "beta": u(ks[7], (C,)),
                "mean": u(ks[8], (C,)), "var": u(ks[9], (C,), 0.5, 1.5)},
        "conv2_w": u(ks[10], (C, C, 3)), "conv2_b": u(ks[11], (C,)),
        "ca_conv1_w": u(jax.random.fold_in(key, 100), (Cr, C, 1)),
        "ca_conv2_w": u(jax.random.fold_in(key, 101), (C, Cr, 1)),
        "sa_conv_w": u(jax.random.fold_in(key, 102), (1, 2, 7)),
    }


if __name__ == "__main__":
    key = jax.random.PRNGKey(0)
    N, C, L = 2, 16, 32                 # in_dim == out_dim == C
    kx, kp = jax.random.split(key)
    x = jax.random.normal(kx, (N, C, L), jnp.float32)
    params = make_params(kp, C)

    ref = reference_forward(x, params)

    # Exact-numerics path (f32 matmuls) against the pure-JAX reference.
    out_f32 = jax.block_until_ready(
        residual_cbam_preact(x, params, compute_dtype=jnp.float32))
    assert out_f32.shape == (N, C, L)
    err_f32 = float(jnp.max(jnp.abs(out_f32 - ref)))
    assert jnp.allclose(out_f32, ref, atol=1e-4, rtol=1e-4), err_f32

    # Default bf16 MXU path (v5e/v6e/v7x-native): looser, relative check.
    out_bf16 = jax.block_until_ready(residual_cbam_preact(x, params))
    rel = float(jnp.linalg.norm(out_bf16 - ref) / jnp.linalg.norm(ref))
    assert rel < 3e-2, f"bf16 relative error {rel}"

    print("KERNEL_OK")
</pallas_src>

<mosaic_0001>
module attributes {stable_mosaic.version = 11 : i64} {
  func.func @_residual_cbam_kernel(%arg0: i32, %arg1: memref<32x16xf32, #tpu.memory_space<vmem>>, %arg2: memref<1x16xf32, #tpu.memory_space<vmem>>, %arg3: memref<1x16xf32, #tpu.memory_space<vmem>>, %arg4: memref<3x16x16xf32, #tpu.memory_space<vmem>>, %arg5: memref<1x16xf32, #tpu.memory_space<vmem>>, %arg6: memref<1x16xf32, #tpu.memory_space<vmem>>, %arg7: memref<3x16x16xf32, #tpu.memory_space<vmem>>, %arg8: memref<1x16xf32, #tpu.memory_space<vmem>>, %arg9: memref<16x2xf32, #tpu.memory_space<vmem>>, %arg10: memref<2x16xf32, #tpu.memory_space<vmem>>, %arg11: memref<2x7xf32, #tpu.memory_space<smem>>, %arg12: memref<32x16xf32, #tpu.memory_space<vmem>>) attributes {dimension_semantics = [#tpu.dimension_semantics<parallel>], iteration_bounds = array<i64: 2>, scalar_prefetch = 0 : i64, scratch_operands = 0 : i64, tpu.core_type = #tpu.core_type<tc>, window_params = [{transform_indices = @transform_0, window_bounds = array<i64: 32, 16>}, {pipeline_mode = #tpu.pipeline_mode<synchronous>, transform_indices = @transform_1, window_bounds = array<i64: 1, 16>}, {pipeline_mode = #tpu.pipeline_mode<synchronous>, transform_indices = @transform_2, window_bounds = array<i64: 1, 16>}, {pipeline_mode = #tpu.pipeline_mode<synchronous>, transform_indices = @transform_3, window_bounds = array<i64: 3, 16, 16>}, {pipeline_mode = #tpu.pipeline_mode<synchronous>, transform_indices = @transform_4, window_bounds = array<i64: 1, 16>}, {pipeline_mode = #tpu.pipeline_mode<synchronous>, transform_indices = @transform_5, window_bounds = array<i64: 1, 16>}, {pipeline_mode = #tpu.pipeline_mode<synchronous>, transform_indices = @transform_6, window_bounds = array<i64: 3, 16, 16>}, {pipeline_mode = #tpu.pipeline_mode<synchronous>, transform_indices = @transform_7, window_bounds = array<i64: 1, 16>}, {pipeline_mode = #tpu.pipeline_mode<synchronous>, transform_indices = @transform_8, window_bounds = array<i64: 16, 2>}, {pipeline_mode = #tpu.pipeline_mode<synchronous>, transform_indices = @transform_9, window_bounds = array<i64: 2, 16>}, {transform_indices = @transform_10, window_bounds = array<i64: 2, 7>}, {transform_indices = @transform_11, window_bounds = array<i64: 32, 16>}]} {
    %0 = tpu.iota {dimensions = array<i32: 0>} : vector<32x1xi32>
    %c32_i32 = arith.constant 32 : i32
    %c0_i32 = arith.constant 0 : i32
    %1 = arith.cmpi eq, %c32_i32, %c0_i32 : i32
    %c1_i32 = arith.constant 1 : i32
    %2 = arith.select %1, %c1_i32, %c32_i32 : i32
    %3 = vector.broadcast %2 : i32 to vector<32x1xi32>
    %4 = arith.remsi %0, %3 : vector<32x1xi32>
    %c0_i32_0 = arith.constant 0 : i32
    %5 = vector.broadcast %c0_i32_0 : i32 to vector<32x1xi32>
    %6 = arith.cmpi ne, %4, %5 : vector<32x1xi32>
    %c0_i32_1 = arith.constant 0 : i32
    %7 = vector.broadcast %c0_i32_1 : i32 to vector<32x1xi32>
    %8 = arith.cmpi slt, %4, %7 : vector<32x1xi32>
    %c0_i32_2 = arith.constant 0 : i32
    %9 = arith.cmpi slt, %2, %c0_i32_2 : i32
    %10 = vector.broadcast %9 : i1 to vector<32x1xi1>
    %11 = vector.broadcast %10 : vector<32x1xi1> to vector<32x1xi1>
    %12 = arith.xori %8, %11 : vector<32x1xi1>
    %13 = arith.andi %12, %6 : vector<32x1xi1>
    %14 = vector.broadcast %2 : i32 to vector<32x1xi32>
    %15 = arith.addi %4, %14 : vector<32x1xi32>
    %16 = arith.select %13, %15, %4 : vector<32x1xi1>, vector<32x1xi32>
    %c0_i32_3 = arith.constant 0 : i32
    %17 = vector.broadcast %c0_i32_3 : i32 to vector<32x1xi32>
    %18 = arith.cmpi ne, %16, %17 : vector<32x1xi32>
    %c31_i32 = arith.constant 31 : i32
    %19 = vector.broadcast %c31_i32 : i32 to vector<32x1xi32>
    %20 = arith.cmpi ne, %16, %19 : vector<32x1xi32>
    %c0 = arith.constant 0 : index
    %c0_4 = arith.constant 0 : index
    %21 = vector.load %arg1[%c0, %c0_4] : memref<32x16xf32, #tpu.memory_space<vmem>>, vector<32x16xf32>
    %c0_5 = arith.constant 0 : index
    %c0_6 = arith.constant 0 : index
    %22 = vector.load %arg2[%c0_5, %c0_6] : memref<1x16xf32, #tpu.memory_space<vmem>>, vector<1x16xf32>
    %23 = vector.broadcast %22 : vector<1x16xf32> to vector<32x16xf32>
    %24 = arith.mulf %21, %23 : vector<32x16xf32>
    %c0_7 = arith.constant 0 : index
    %c0_8 = arith.constant 0 : index
    %25 = vector.load %arg3[%c0_7, %c0_8] : memref<1x16xf32, #tpu.memory_space<vmem>>, vector<1x16xf32>
    %26 = vector.broadcast %25 : vector<1x16xf32> to vector<32x16xf32>
    %27 = arith.addf %24, %26 : vector<32x16xf32>
    %cst = arith.constant 0.000000e+00 : f32
    %28 = vector.broadcast %cst : f32 to vector<32x16xf32>
    %29 = arith.maximumf %27, %28 : vector<32x16xf32>
    %c1_i32_9 = arith.constant 1 : i32
    %30 = tpu.dynamic_rotate %29 by %c1_i32_9 dim 0 : vector<32x16xf32>, i32 -> vector<32x16xf32>
    %cst_10 = arith.constant 0.000000e+00 : f32
    %31 = vector.shape_cast %18 : vector<32x1xi1> to vector<32x1xi1>
    %32 = vector.broadcast %31 : vector<32x1xi1> to vector<32x16xi1>
    %33 = vector.broadcast %cst_10 : f32 to vector<32x16xf32>
    %34 = arith.select %32, %30, %33 : vector<32x16xi1>, vector<32x16xf32>
    %c31_i32_11 = arith.constant 31 : i32
    %35 = tpu.dynamic_rotate %29 by %c31_i32_11 dim 0 : vector<32x16xf32>, i32 -> vector<32x16xf32>
    %cst_12 = arith.constant 0.000000e+00 : f32
    %36 = vector.shape_cast %20 : vector<32x1xi1> to vector<32x1xi1>
    %37 = vector.broadcast %36 : vector<32x1xi1> to vector<32x16xi1>
    %38 = vector.broadcast %cst_12 : f32 to vector<32x16xf32>
    %39 = arith.select %37, %35, %38 : vector<32x16xi1>, vector<32x16xf32>
    %c0_13 = arith.constant 0 : index
    %c0_14 = arith.constant 0 : index
    %c0_15 = arith.constant 0 : index
    %40 = vector.load %arg4[%c0_13, %c0_14, %c0_15] : memref<3x16x16xf32, #tpu.memory_space<vmem>>, vector<1x16x16xf32>
    %41 = vector.shape_cast %40 : vector<1x16x16xf32> to vector<16x16xf32>
    %cst_16 = arith.constant dense<0.000000e+00> : vector<32x16xf32>
    %42 = tpu.matmul %34, %41, %cst_16 {dimension_numbers = #tpu.dot_dimension_numbers<[1], [0], [0], [1], [0, 0, 1, 1], [], []>} : vector<32x16xf32>, vector<16x16xf32>, vector<32x16xf32> -> vector<32x16xf32>
    %c1 = arith.constant 1 : index
    %c0_17 = arith.constant 0 : index
    %c0_18 = arith.constant 0 : index
    %43 = vector.load %arg4[%c1, %c0_17, %c0_18] : memref<3x16x16xf32, #tpu.memory_space<vmem>>, vector<1x16x16xf32>
    %44 = vector.shape_cast %43 : vector<1x16x16xf32> to vector<16x16xf32>
    %cst_19 = arith.constant dense<0.000000e+00> : vector<32x16xf32>
    %45 = tpu.matmul %29, %44, %cst_19 {dimension_numbers = #tpu.dot_dimension_numbers<[1], [0], [0], [1], [0, 0, 1, 1], [], []>} : vector<32x16xf32>, vector<16x16xf32>, vector<32x16xf32> -> vector<32x16xf32>
    %46 = arith.addf %42, %45 : vector<32x16xf32>
    %c2 = arith.constant 2 : index
    %c0_20 = arith.constant 0 : index
    %c0_21 = arith.constant 0 : index
    %47 = vector.load %arg4[%c2, %c0_20, %c0_21] : memref<3x16x16xf32, #tpu.memory_space<vmem>>, vector<1x16x16xf32>
    %48 = vector.shape_cast %47 : vector<1x16x16xf32> to vector<16x16xf32>
    %cst_22 = arith.constant dense<0.000000e+00> : vector<32x16xf32>
    %49 = tpu.matmul %39, %48, %cst_22 {dimension_numbers = #tpu.dot_dimension_numbers<[1], [0], [0], [1], [0, 0, 1, 1], [], []>} : vector<32x16xf32>, vector<16x16xf32>, vector<32x16xf32> -> vector<32x16xf32>
    %50 = arith.addf %46, %49 : vector<32x16xf32>
    %c0_23 = arith.constant 0 : index
    %c0_24 = arith.constant 0 : index
    %51 = vector.load %arg5[%c0_23, %c0_24] : memref<1x16xf32, #tpu.memory_space<vmem>>, vector<1x16xf32>
    %52 = vector.broadcast %51 : vector<1x16xf32> to vector<32x16xf32>
    %53 = arith.mulf %50, %52 : vector<32x16xf32>
    %c0_25 = arith.constant 0 : index
    %c0_26 = arith.constant 0 : index
    %54 = vector.load %arg6[%c0_25, %c0_26] : memref<1x16xf32, #tpu.memory_space<vmem>>, vector<1x16xf32>
    %55 = vector.broadcast %54 : vector<1x16xf32> to vector<32x16xf32>
    %56 = arith.addf %53, %55 : vector<32x16xf32>
    %cst_27 = arith.constant 0.000000e+00 : f32
    %57 = vector.broadcast %cst_27 : f32 to vector<32x16xf32>
    %58 = arith.maximumf %56, %57 : vector<32x16xf32>
    %c1_i32_28 = arith.constant 1 : i32
    %59 = tpu.dynamic_rotate %58 by %c1_i32_28 dim 0 : vector<32x16xf32>, i32 -> vector<32x16xf32>
    %cst_29 = arith.constant 0.000000e+00 : f32
    %60 = vector.shape_cast %18 : vector<32x1xi1> to vector<32x1xi1>
    %61 = vector.broadcast %60 : vector<32x1xi1> to vector<32x16xi1>
    %62 = vector.broadcast %cst_29 : f32 to vector<32x16xf32>
    %63 = arith.select %61, %59, %62 : vector<32x16xi1>, vector<32x16xf32>
    %c31_i32_30 = arith.constant 31 : i32
    %64 = tpu.dynamic_rotate %58 by %c31_i32_30 dim 0 : vector<32x16xf32>, i32 -> vector<32x16xf32>
    %cst_31 = arith.constant 0.000000e+00 : f32
    %65 = vector.shape_cast %20 : vector<32x1xi1> to vector<32x1xi1>
    %66 = vector.broadcast %65 : vector<32x1xi1> to vector<32x16xi1>
    %67 = vector.broadcast %cst_31 : f32 to vector<32x16xf32>
    %68 = arith.select %66, %64, %67 : vector<32x16xi1>, vector<32x16xf32>
    %c0_32 = arith.constant 0 : index
    %c0_33 = arith.constant 0 : index
    %c0_34 = arith.constant 0 : index
    %69 = vector.load %arg7[%c0_32, %c0_33, %c0_34] : memref<3x16x16xf32, #tpu.memory_space<vmem>>, vector<1x16x16xf32>
    %70 = vector.shape_cast %69 : vector<1x16x16xf32> to vector<16x16xf32>
    %cst_35 = arith.constant dense<0.000000e+00> : vector<32x16xf32>
    %71 = tpu.matmul %63, %70, %cst_35 {dimension_numbers = #tpu.dot_dimension_numbers<[1], [0], [0], [1], [0, 0, 1, 1], [], []>} : vector<32x16xf32>, vector<16x16xf32>, vector<32x16xf32> -> vector<32x16xf32>
    %c1_36 = arith.constant 1 : index
    %c0_37 = arith.constant 0 : index
    %c0_38 = arith.constant 0 : index
    %72 = vector.load %arg7[%c1_36, %c0_37, %c0_38] : memref<3x16x16xf32, #tpu.memory_space<vmem>>, vector<1x16x16xf32>
    %73 = vector.shape_cast %72 : vector<1x16x16xf32> to vector<16x16xf32>
    %cst_39 = arith.constant dense<0.000000e+00> : vector<32x16xf32>
    %74 = tpu.matmul %58, %73, %cst_39 {dimension_numbers = #tpu.dot_dimension_numbers<[1], [0], [0], [1], [0, 0, 1, 1], [], []>} : vector<32x16xf32>, vector<16x16xf32>, vector<32x16xf32> -> vector<32x16xf32>
    %75 = arith.addf %71, %74 : vector<32x16xf32>
    %c2_40 = arith.constant 2 : index
    %c0_41 = arith.constant 0 : index
    %c0_42 = arith.constant 0 : index
    %76 = vector.load %arg7[%c2_40, %c0_41, %c0_42] : memref<3x16x16xf32, #tpu.memory_space<vmem>>, vector<1x16x16xf32>
    %77 = vector.shape_cast %76 : vector<1x16x16xf32> to vector<16x16xf32>
    %cst_43 = arith.constant dense<0.000000e+00> : vector<32x16xf32>
    %78 = tpu.matmul %68, %77, %cst_43 {dimension_numbers = #tpu.dot_dimension_numbers<[1], [0], [0], [1], [0, 0, 1, 1], [], []>} : vector<32x16xf32>, vector<16x16xf32>, vector<32x16xf32> -> vector<32x16xf32>
    %79 = arith.addf %75, %78 : vector<32x16xf32>
    %c0_44 = arith.constant 0 : index
    %c0_45 = arith.constant 0 : index
    %80 = vector.load %arg8[%c0_44, %c0_45] : memref<1x16xf32, #tpu.memory_space<vmem>>, vector<1x16xf32>
    %81 = vector.broadcast %80 : vector<1x16xf32> to vector<32x16xf32>
    %82 = arith.addf %79, %81 : vector<32x16xf32>
    %83 = vector.shape_cast %82 : vector<32x16xf32> to vector<1x32x16xf32>
    %cst_46 = arith.constant dense<0.000000e+00> : vector<1x16xf32>
    %84 = vector.multi_reduction <add>, %83, %cst_46 [1] : vector<1x32x16xf32> to vector<1x16xf32>
    %cst_47 = arith.constant 3.200000e+01 : f32
    %85 = vector.broadcast %cst_47 : f32 to vector<1x16xf32>
    %86 = arith.divf %84, %85 : vector<1x16xf32>
    %cst_48 = arith.constant dense<0xFF800000> : vector<1x16xf32>
    %87 = vector.multi_reduction <maximumf>, %83, %cst_48 [1] : vector<1x32x16xf32> to vector<1x16xf32>
    %88 = tpu.concatenate %86, %87 in 0 : vector<1x16xf32>, vector<1x16xf32> -> vector<2x16xf32>
    %c0_49 = arith.constant 0 : index
    %c0_50 = arith.constant 0 : index
    %89 = vector.load %arg9[%c0_49, %c0_50] : memref<16x2xf32, #tpu.memory_space<vmem>>, vector<16x2xf32>
    %cst_51 = arith.constant dense<0.000000e+00> : vector<2x2xf32>
    %90 = tpu.matmul %88, %89, %cst_51 {dimension_numbers = #tpu.dot_dimension_numbers<[1], [0], [0], [1], [0, 0, 1, 1], [], []>} : vector<2x16xf32>, vector<16x2xf32>, vector<2x2xf32> -> vector<2x2xf32>
    %cst_52 = arith.constant 0.000000e+00 : f32
    %91 = vector.broadcast %cst_52 : f32 to vector<2x2xf32>
    %92 = arith.maximumf %90, %91 : vector<2x2xf32>
    %c0_53 = arith.constant 0 : index
    %c0_54 = arith.constant 0 : index
    %93 = vector.load %arg10[%c0_53, %c0_54] : memref<2x16xf32, #tpu.memory_space<vmem>>, vector<2x16xf32>
    %cst_55 = arith.constant dense<0.000000e+00> : vector<2x16xf32>
    %94 = tpu.matmul %92, %93, %cst_55 {dimension_numbers = #tpu.dot_dimension_numbers<[1], [0], [0], [1], [0, 0, 1, 1], [], []>} : vector<2x2xf32>, vector<2x16xf32>, vector<2x16xf32> -> vector<2x16xf32>
    %95 = vector.extract_strided_slice %94 {offsets = [0, 0], sizes = [1, 16], strides = [1, 1]} : vector<2x16xf32> to vector<1x16xf32>
    %96 = vector.extract_strided_slice %94 {offsets = [1, 0], sizes = [1, 16], strides = [1, 1]} : vector<2x16xf32> to vector<1x16xf32>
    %97 = arith.addf %95, %96 : vector<1x16xf32>
    %98 = arith.negf %97 : vector<1x16xf32>
    %99 = math.exp %98 : vector<1x16xf32>
    %cst_56 = arith.constant 1.000000e+00 : f32
    %100 = vector.broadcast %cst_56 : f32 to vector<1x16xf32>
    %101 = arith.addf %100, %99 : vector<1x16xf32>
    %102 = arith.divf %100, %101 : vector<1x16xf32>
    %103 = vector.shape_cast %102 : vector<1x16xf32> to vector<1x1x16xf32>
    %104 = vector.broadcast %103 : vector<1x1x16xf32> to vector<1x32x16xf32>
    %105 = arith.mulf %83, %104 : vector<1x32x16xf32>
    %106 = vector.shape_cast %105 : vector<1x32x16xf32> to vector<32x16xf32>
    %cst_57 = arith.constant dense<0.000000e+00> : vector<32xf32>
    %107 = vector.multi_reduction <add>, %106, %cst_57 [1] : vector<32x16xf32> to vector<32xf32>
    %108 = vector.shape_cast %107 : vector<32xf32> to vector<32x1xf32>
    %cst_58 = arith.constant 1.600000e+01 : f32
    %109 = vector.broadcast %cst_58 : f32 to vector<32x1xf32>
    %110 = arith.divf %108, %109 : vector<32x1xf32>
    %cst_59 = arith.constant dense<0xFF800000> : vector<32xf32>
    %111 = vector.multi_reduction <maximumf>, %106, %cst_59 [1] : vector<32x16xf32> to vector<32xf32>
    %112 = vector.shape_cast %111 : vector<32xf32> to vector<32x1xf32>
    %c0_60 = arith.constant 0 : index
    %c3 = arith.constant 3 : index
    %113 = memref.load %arg11[%c0_60, %c3] : memref<2x7xf32, #tpu.memory_space<smem>>
    %114 = vector.broadcast %113 : f32 to vector<32x1xf32>
    %115 = arith.mulf %110, %114 : vector<32x1xf32>
    %c1_61 = arith.constant 1 : index
    %c3_62 = arith.constant 3 : index
    %116 = memref.load %arg11[%c1_61, %c3_62] : memref<2x7xf32, #tpu.memory_space<smem>>
    %117 = vector.broadcast %116 : f32 to vector<32x1xf32>
    %118 = arith.mulf %112, %117 : vector<32x1xf32>
    %119 = arith.addf %115, %118 : vector<32x1xf32>
    %c3_i32 = arith.constant 3 : i32
    %120 = tpu.dynamic_rotate %110 by %c3_i32 dim 0 : vector<32x1xf32>, i32 -> vector<32x1xf32>
    %c3_i32_63 = arith.constant 3 : i32
    %121 = tpu.dynamic_rotate %112 by %c3_i32_63 dim 0 : vector<32x1xf32>, i32 -> vector<32x1xf32>
    %c0_64 = arith.constant 0 : index
    %c0_65 = arith.constant 0 : index
    %122 = memref.load %arg11[%c0_64, %c0_65] : memref<2x7xf32, #tpu.memory_space<smem>>
    %123 = vector.broadcast %122 : f32 to vector<32x1xf32>
    %124 = arith.mulf %120, %123 : vector<32x1xf32>
    %c1_66 = arith.constant 1 : index
    %c0_67 = arith.constant 0 : index
    %125 = memref.load %arg11[%c1_66, %c0_67] : memref<2x7xf32, #tpu.memory_space<smem>>
    %126 = vector.broadcast %125 : f32 to vector<32x1xf32>
    %127 = arith.mulf %121, %126 : vector<32x1xf32>
    %128 = arith.addf %124, %127 : vector<32x1xf32>
    %c3_i32_68 = arith.constant 3 : i32
    %129 = vector.broadcast %c3_i32_68 : i32 to vector<32x1xi32>
    %130 = arith.cmpi sge, %16, %129 : vector<32x1xi32>
    %cst_69 = arith.constant 0.000000e+00 : f32
    %131 = vector.broadcast %cst_69 : f32 to vector<32x1xf32>
    %132 = arith.select %130, %128, %131 : vector<32x1xi1>, vector<32x1xf32>
    %133 = arith.addf %119, %132 : vector<32x1xf32>
    %c2_i32 = arith.constant 2 : i32
    %134 = tpu.dynamic_rotate %110 by %c2_i32 dim 0 : vector<32x1xf32>, i32 -> vector<32x1xf32>
    %c2_i32_70 = arith.constant 2 : i32
    %135 = tpu.dynamic_rotate %112 by %c2_i32_70 dim 0 : vector<32x1xf32>, i32 -> vector<32x1xf32>
    %c0_71 = arith.constant 0 : index
    %c1_72 = arith.constant 1 : index
    %136 = memref.load %arg11[%c0_71, %c1_72] : memref<2x7xf32, #tpu.memory_space<smem>>
    %137 = vector.broadcast %136 : f32 to vector<32x1xf32>
    %138 = arith.mulf %134, %137 : vector<32x1xf32>
    %c1_73 = arith.constant 1 : index
    %c1_74 = arith.constant 1 : index
    %139 = memref.load %arg11[%c1_73, %c1_74] : memref<2x7xf32, #tpu.memory_space<smem>>
    %140 = vector.broadcast %139 : f32 to vector<32x1xf32>
    %141 = arith.mulf %135, %140 : vector<32x1xf32>
    %142 = arith.addf %138, %141 : vector<32x1xf32>
    %c2_i32_75 = arith.constant 2 : i32
    %143 = vector.broadcast %c2_i32_75 : i32 to vector<32x1xi32>
    %144 = arith.cmpi sge, %16, %143 : vector<32x1xi32>
    %cst_76 = arith.constant 0.000000e+00 : f32
    %145 = vector.broadcast %cst_76 : f32 to vector<32x1xf32>
    %146 = arith.select %144, %142, %145 : vector<32x1xi1>, vector<32x1xf32>
    %147 = arith.addf %133, %146 : vector<32x1xf32>
    %c1_i32_77 = arith.constant 1 : i32
    %148 = tpu.dynamic_rotate %110 by %c1_i32_77 dim 0 : vector<32x1xf32>, i32 -> vector<32x1xf32>
    %c1_i32_78 = arith.constant 1 : i32
    %149 = tpu.dynamic_rotate %112 by %c1_i32_78 dim 0 : vector<32x1xf32>, i32 -> vector<32x1xf32>
    %c0_79 = arith.constant 0 : index
    %c2_80 = arith.constant 2 : index
    %150 = memref.load %arg11[%c0_79, %c2_80] : memref<2x7xf32, #tpu.memory_space<smem>>
    %151 = vector.broadcast %150 : f32 to vector<32x1xf32>
    %152 = arith.mulf %148, %151 : vector<32x1xf32>
    %c1_81 = arith.constant 1 : index
    %c2_82 = arith.constant 2 : index
    %153 = memref.load %arg11[%c1_81, %c2_82] : memref<2x7xf32, #tpu.memory_space<smem>>
    %154 = vector.broadcast %153 : f32 to vector<32x1xf32>
    %155 = arith.mulf %149, %154 : vector<32x1xf32>
    %156 = arith.addf %152, %155 : vector<32x1xf32>
    %c1_i32_83 = arith.constant 1 : i32
    %157 = vector.broadcast %c1_i32_83 : i32 to vector<32x1xi32>
    %158 = arith.cmpi sge, %16, %157 : vector<32x1xi32>
    %cst_84 = arith.constant 0.000000e+00 : f32
    %159 = vector.broadcast %cst_84 : f32 to vector<32x1xf32>
    %160 = arith.select %158, %156, %159 : vector<32x1xi1>, vector<32x1xf32>
    %161 = arith.addf %147, %160 : vector<32x1xf32>
    %c31_i32_85 = arith.constant 31 : i32
    %162 = tpu.dynamic_rotate %110 by %c31_i32_85 dim 0 : vector<32x1xf32>, i32 -> vector<32x1xf32>
    %c31_i32_86 = arith.constant 31 : i32
    %163 = tpu.dynamic_rotate %112 by %c31_i32_86 dim 0 : vector<32x1xf32>, i32 -> vector<32x1xf32>
    %c0_87 = arith.constant 0 : index
    %c4 = arith.constant 4 : index
    %164 = memref.load %arg11[%c0_87, %c4] : memref<2x7xf32, #tpu.memory_space<smem>>
    %165 = vector.broadcast %164 : f32 to vector<32x1xf32>
    %166 = arith.mulf %162, %165 : vector<32x1xf32>
    %c1_88 = arith.constant 1 : index
    %c4_89 = arith.constant 4 : index
    %167 = memref.load %arg11[%c1_88, %c4_89] : memref<2x7xf32, #tpu.memory_space<smem>>
    %168 = vector.broadcast %167 : f32 to vector<32x1xf32>
    %169 = arith.mulf %163, %168 : vector<32x1xf32>
    %170 = arith.addf %166, %169 : vector<32x1xf32>
    %c31_i32_90 = arith.constant 31 : i32
    %171 = vector.broadcast %c31_i32_90 : i32 to vector<32x1xi32>
    %172 = arith.cmpi slt, %16, %171 : vector<32x1xi32>
    %cst_91 = arith.constant 0.000000e+00 : f32
    %173 = vector.broadcast %cst_91 : f32 to vector<32x1xf32>
    %174 = arith.select %172, %170, %173 : vector<32x1xi1>, vector<32x1xf32>
    %175 = arith.addf %161, %174 : vector<32x1xf32>
    %c30_i32 = arith.constant 30 : i32
    %176 = tpu.dynamic_rotate %110 by %c30_i32 dim 0 : vector<32x1xf32>, i32 -> vector<32x1xf32>
    %c30_i32_92 = arith.constant 30 : i32
    %177 = tpu.dynamic_rotate %112 by %c30_i32_92 dim 0 : vector<32x1xf32>, i32 -> vector<32x1xf32>
    %c0_93 = arith.constant 0 : index
    %c5 = arith.constant 5 : index
    %178 = memref.load %arg11[%c0_93, %c5] : memref<2x7xf32, #tpu.memory_space<smem>>
    %179 = vector.broadcast %178 : f32 to vector<32x1xf32>
    %180 = arith.mulf %176, %179 : vector<32x1xf32>
    %c1_94 = arith.constant 1 : index
    %c5_95 = arith.constant 5 : index
    %181 = memref.load %arg11[%c1_94, %c5_95] : memref<2x7xf32, #tpu.memory_space<smem>>
    %182 = vector.broadcast %181 : f32 to vector<32x1xf32>
    %183 = arith.mulf %177, %182 : vector<32x1xf32>
    %184 = arith.addf %180, %183 : vector<32x1xf32>
    %c30_i32_96 = arith.constant 30 : i32
    %185 = vector.broadcast %c30_i32_96 : i32 to vector<32x1xi32>
    %186 = arith.cmpi slt, %16, %185 : vector<32x1xi32>
    %cst_97 = arith.constant 0.000000e+00 : f32
    %187 = vector.broadcast %cst_97 : f32 to vector<32x1xf32>
    %188 = arith.select %186, %184, %187 : vector<32x1xi1>, vector<32x1xf32>
    %189 = arith.addf %175, %188 : vector<32x1xf32>
    %c29_i32 = arith.constant 29 : i32
    %190 = tpu.dynamic_rotate %110 by %c29_i32 dim 0 : vector<32x1xf32>, i32 -> vector<32x1xf32>
    %c29_i32_98 = arith.constant 29 : i32
    %191 = tpu.dynamic_rotate %112 by %c29_i32_98 dim 0 : vector<32x1xf32>, i32 -> vector<32x1xf32>
    %c0_99 = arith.constant 0 : index
    %c6 = arith.constant 6 : index
    %192 = memref.load %arg11[%c0_99, %c6] : memref<2x7xf32, #tpu.memory_space<smem>>
    %193 = vector.broadcast %192 : f32 to vector<32x1xf32>
    %194 = arith.mulf %190, %193 : vector<32x1xf32>
    %c1_100 = arith.constant 1 : index
    %c6_101 = arith.constant 6 : index
    %195 = memref.load %arg11[%c1_100, %c6_101] : memref<2x7xf32, #tpu.memory_space<smem>>
    %196 = vector.broadcast %195 : f32 to vector<32x1xf32>
    %197 = arith.mulf %191, %196 : vector<32x1xf32>
    %198 = arith.addf %194, %197 : vector<32x1xf32>
    %c29_i32_102 = arith.constant 29 : i32
    %199 = vector.broadcast %c29_i32_102 : i32 to vector<32x1xi32>
    %200 = arith.cmpi slt, %16, %199 : vector<32x1xi32>
    %cst_103 = arith.constant 0.000000e+00 : f32
    %201 = vector.broadcast %cst_103 : f32 to vector<32x1xf32>
    %202 = arith.select %200, %198, %201 : vector<32x1xi1>, vector<32x1xf32>
    %203 = arith.addf %189, %202 : vector<32x1xf32>
    %204 = arith.negf %203 : vector<32x1xf32>
    %205 = math.exp %204 : vector<32x1xf32>
    %cst_104 = arith.constant 1.000000e+00 : f32
    %206 = vector.broadcast %cst_104 : f32 to vector<32x1xf32>
    %207 = arith.addf %206, %205 : vector<32x1xf32>
    %208 = arith.divf %206, %207 : vector<32x1xf32>
    %209 = vector.broadcast %208 : vector<32x1xf32> to vector<32x16xf32>
    %210 = arith.mulf %106, %209 : vector<32x16xf32>
    %c0_105 = arith.constant 0 : index
    %c0_106 = arith.constant 0 : index
    %211 = vector.load %arg1[%c0_105, %c0_106] : memref<32x16xf32, #tpu.memory_space<vmem>>, vector<32x16xf32>
    %212 = arith.addf %210, %211 : vector<32x16xf32>
    %c0_107 = arith.constant 0 : index
    %c0_108 = arith.constant 0 : index
    %213 = vector.load %arg12[%c0_107, %c0_108] : memref<32x16xf32, #tpu.memory_space<vmem>>, vector<32x16xf32>
    tpu.vector_store %arg12[%c0_107, %c0_108], %212 {strides = array<i32>} : memref<32x16xf32, #tpu.memory_space<vmem>>, vector<32x16xf32>,
    return
  }
  func.func @transform_0(%arg0: i32) -> (i32, i32) {
    %c0_i32 = arith.constant 0 : i32
    %c0_i32_0 = arith.constant 0 : i32
    return %arg0, %c0_i32 : i32, i32
  }
  func.func @transform_1(%arg0: i32) -> (i32, i32) {
    %c0_i32 = arith.constant 0 : i32
    %c0_i32_0 = arith.constant 0 : i32
    %c0_i32_1 = arith.constant 0 : i32
    return %c0_i32, %c0_i32_0 : i32, i32
  }
  func.func @transform_2(%arg0: i32) -> (i32, i32) {
    %c0_i32 = arith.constant 0 : i32
    %c0_i32_0 = arith.constant 0 : i32
    %c0_i32_1 = arith.constant 0 : i32
    return %c0_i32, %c0_i32_0 : i32, i32
  }
  func.func @transform_3(%arg0: i32) -> (i32, i32, i32) {
    %c0_i32 = arith.constant 0 : i32
    %c0_i32_0 = arith.constant 0 : i32
    %c0_i32_1 = arith.constant 0 : i32
    %c0_i32_2 = arith.constant 0 : i32
    return %c0_i32, %c0_i32_0, %c0_i32_1 : i32, i32, i32
  }
  func.func @transform_4(%arg0: i32) -> (i32, i32) {
    %c0_i32 = arith.constant 0 : i32
    %c0_i32_0 = arith.constant 0 : i32
    %c0_i32_1 = arith.constant 0 : i32
    return %c0_i32, %c0_i32_0 : i32, i32
  }
  func.func @transform_5(%arg0: i32) -> (i32, i32) {
    %c0_i32 = arith.constant 0 : i32
    %c0_i32_0 = arith.constant 0 : i32
    %c0_i32_1 = arith.constant 0 : i32
    return %c0_i32, %c0_i32_0 : i32, i32
  }
  func.func @transform_6(%arg0: i32) -> (i32, i32, i32) {
    %c0_i32 = arith.constant 0 : i32
    %c0_i32_0 = arith.constant 0 : i32
    %c0_i32_1 = arith.constant 0 : i32
    %c0_i32_2 = arith.constant 0 : i32
    return %c0_i32, %c0_i32_0, %c0_i32_1 : i32, i32, i32
  }
  func.func @transform_7(%arg0: i32) -> (i32, i32) {
    %c0_i32 = arith.constant 0 : i32
    %c0_i32_0 = arith.constant 0 : i32
    %c0_i32_1 = arith.constant 0 : i32
    return %c0_i32, %c0_i32_0 : i32, i32
  }
  func.func @transform_8(%arg0: i32) -> (i32, i32) {
    %c0_i32 = arith.constant 0 : i32
    %c0_i32_0 = arith.constant 0 : i32
    %c0_i32_1 = arith.constant 0 : i32
    return %c0_i32, %c0_i32_0 : i32, i32
  }
  func.func @transform_9(%arg0: i32) -> (i32, i32) {
    %c0_i32 = arith.constant 0 : i32
    %c0_i32_0 = arith.constant 0 : i32
    %c0_i32_1 = arith.constant 0 : i32
    return %c0_i32, %c0_i32_0 : i32, i32
  }
  func.func @transform_10(%arg0: i32) -> (i32, i32) {
    %c0_i32 = arith.constant 0 : i32
    %c0_i32_0 = arith.constant 0 : i32
    %c0_i32_1 = arith.constant 0 : i32
    return %c0_i32, %c0_i32_0 : i32, i32
  }
  func.func @transform_11(%arg0: i32) -> (i32, i32) {
    %c0_i32 = arith.constant 0 : i32
    %c0_i32_0 = arith.constant 0 : i32
    return %arg0, %c0_i32 : i32, i32
  }
}

</mosaic_0001>

<bundles_post_ra>
// kernel: tpu_custom_call.1
= control target key start
LH: loop header
LB: loop body
LE: loop exit
PB: predicated region body
PF: predicated region fallthrough
CT: control target
= control target key end

     0   :  { %16 = vsyncpa [#allocation3], 0  ;;  %s2933_s0 = inlined_call_operand.vmem [shape: f32[64,16], index: 0, kind: input, shape index: {}]   ;;  %s2934_s1 = inlined_call_operand.vmem [shape: f32[1,16], index: 1, kind: input, shape index: {}]   ;;  %s2935_s2 = inlined_call_operand.hbm [shape: f32[1,16], index: 2, kind: input, shape index: {}]   ;;  %s2936_s3 = inlined_call_operand.vmem [shape: f32[3,16,16], index: 3, kind: input, shape index: {}]   ;;  %s2937_s4 = inlined_call_operand.vmem [shape: f32[1,16], index: 4, kind: input, shape index: {}]   ;;  %s2938_s5 = inlined_call_operand.vmem [shape: f32[1,16], index: 5, kind: input, shape index: {}]   ;;  %s2939_s6 = inlined_call_operand.vmem [shape: f32[3,16,16], index: 6, kind: input, shape index: {}]   ;;  %s2940_s7 = inlined_call_operand.vmem [shape: f32[1,16], index: 7, kind: input, shape index: {}]   ;;  %s2941_s8 = inlined_call_operand.vmem [shape: f32[16,2], index: 8, kind: input, shape index: {}]   ;;  %s2942_s9 = inlined_call_operand.vmem [shape: f32[2,16], index: 9, kind: input, shape index: {}]   ;;  %s2943_s10 = inlined_call_operand.vmem [shape: f32[2,7], index: 10, kind: input, shape index: {}]   ;;  %s2944_s11 = inlined_call_operand.vmem [shape: f32[64,16], index: 11, kind: output, shape index: {}]  }
   0x1   :  { %17 = vsyncpa [#allocation4], 0  ;;  %s2236_s17 = smov 0  }
   0x2 LB: > { %s1870_s18 = sadd.s32 4294967295, %s2169_s17   ;;  %p1872_p0 = scmp.ge.s32.totalorder %s2169_s17, 1  ;;  %s2169_s17 = sphi %s2236_s17, %s23_s17  }
   0x3   : > { %p290_p1 = scmp.lt.s32.totalorder %s2169_s17, 3  ;;  %p2250_p3 = scmp.eq.s32.totalorder %s1870_s18, 0 }
   0x4   : > { %s2171_s21 = smov [#allocation2]   ;;  %s338_s25 = sshll.u32 %s2943_s10, 4  ;;  %s339_s25 = int_to_ptr.vmem [resolvable:$true] %s338_s25 }
   0x5   : > { %p2244_p2 = pnand %p1872_p0, %p290_p1  ;;  %s306_s22 = sshll.u32 %s2171_s21, 4  ;;  %s307_s22 = int_to_ptr.vmem [resolvable:$true] %s306_s22 }
   0x6   : > { %s2966_s20 = scalar_select %p2250_p3, 1, 0 }
   0x7   : > { %s2965_s19 = scalar_select %p2244_p2, 1, 0 }
   0x8   : > { %p2064_p4 = pneg %p2244_p2  ;;  %s2125_s27 = scalar_lea.vmem %s307_s22, 16 }
   0x9   : > { %p2126_p7 = scmp.ne.s32.totalorder %s307_s22, %s2125_s27  ;;  %s2132_s28 = scalar_lea.vmem %s307_s22, 32 }
   0xa   : > { %p2261_p5 = pnand %p2250_p3, %p2064_p4  ;;  %p2133_p10 = scmp.lt.s32.totalorder %s307_s22, %s307_s22 }
   0xb   : > { %p2134_p11 = scmp.lt.s32.totalorder %s2132_s28, %s2125_s27 }
   0xc   : > { %p2116_p6 = pneg %p2261_p5 }
   0xd   : > { %p2135_p12 = por %p2134_p11, %p2133_p10 }
   0xe   : > { %p2128_p8 = pnand %p2126_p7, %p2116_p6 }
  0x10   : > { %p2129_p9 = pneg %p2128_p8 }
  0x12   : > { %p2136_p13 = pnand %p2135_p12, %p2129_p9 }
  0x14   : > { %2139 = shalt.err (!%p2136_p13)
}
  0x15   : > { %2067 = dma.hbm_to_vmem [thread:$0]  (!%p2261_p5), %s2935_s2, 16, %s307_s22, [#allocation3]  }
  0x16   : > { %s2140_s12 = scalar_lea.vmem %s339_s25, 32  ;;  %p2148_p7 = scmp.lt.s32.totalorder %s339_s25, %s339_s25 }
  0x17   : > { %p2141_p0 = scmp.ne.s32.totalorder %s339_s25, %s2140_s12  ;;  %p2149_p8 = scmp.lt.s32.totalorder %s2140_s12, %s2140_s12 }
  0x19   : > { %p2143_p1 = pnand %p2141_p0, %p2116_p6  ;;  %p2150_p3 = por %p2149_p8, %p2148_p7 }
  0x1b   : > { %p2144_p4 = pneg %p2143_p1 }
  0x1d   : > { %p2151_p2 = pnand %p2150_p3, %p2144_p4 }
  0x1f   : > { %2154 = shalt.err (!%p2151_p2)
}
  0x20   : > { %s2172_s13 = smov [#allocation5]   ;;  %p2968_p9 = scmp.ne.s32.totalorder %s2965_s19, 0 }
  0x21   : > { %2070 = dma.vmem_to_smem (!%p2261_p5), %s339_s25, 32, %s2172_s13, [#allocation4]  }
  0x22   : > { %360 = sbr.rel (%p2968_p9) target bundleno = 1302 (0x516), region = 64  ;;  %p2969_p10 = scmp.ne.s32.totalorder (!%p2968_p9), %s2966_s20, 0 }
  0x27   : > { %2160 = dma.done.wait (%p2969_p10), [#allocation3], 16  }
  0x28   : > { %2162 = vsyncadd (%p2969_p10), [#allocation3], 4294967280 }
  0x29   : > { %2164 = dma.done.wait (%p2969_p10), [#allocation4], 32  }
  0x2a   : > { %2166 = vsyncadd (%p2969_p10), [#allocation4], 4294967264 }
  0x2b   : > { %370 = sfence }
  0x2c   : > { %v1886_v0 = vld [vmem:[%s2936_s3 + $0x18] sm:$0xff]  ;;  %v1885_v1 = vld [vmem:[%s2936_s3 + $0x10] sm:$0xff]  ;;  %s1879_s21 = sshll.u32 %s1870_s18, 2  ;;  %v551_v2 = vld [vmem:[%s2936_s3 + $0x8] sm:$0xff]  ;;  %v417_v5 = vlaneseq  ;;  %vm555_vm0 = vcmask 130048   ;;  %vm2174_vm5 = vmmov 0  }
  0x2d   : > { %1984 = vmatprep.subr.mxu0 %v1886_v0  ;;  %p406_p2 = scmp.lt.s32.totalorder %s1879_s21, 7  ;;  %v1896_v3 = vld [vmem:[%s2936_s3 + $0x28] sm:$0xff]  ;;  %1994 = vmatprep.subr.mxu1 %v551_v2  ;;  %v550_v4 = vld [vmem:[%s2936_s3] sm:$0xff]  ;;  %v1904_v47 = vld [vmem:[%s2939_s6 + $0x18] sm:$0xff]  ;;  %vm1329_vm6 = vcmask 1041408   ;;  %vm1246_vm7 = vcmask 1040384  }
  0x2e   : > { %1985 = vmatpush3.msra.mxu0 %v1886_v0  ;;  %1995 = vmatpush3.msra.mxu1 %v551_v2  ;;  %v1883_v6 = vld [vmem:[%s2934_s1] ss:$0 sm:$0xff]  ;;  %v2323_v11 = vshrl.u32 %v417_v5, 7  ;;  %v1903_v48 = vld [vmem:[%s2939_s6 + $0x10] sm:$0xff]  ;;  %v905_v49 = vld [vmem:[%s2939_s6 + $0x8] sm:$0xff]  ;;  %vm1325_vm8 = vcmask 15360  }
  0x2f   : > { %1986 = vmatprep.subr.mxu0 %v1885_v1  ;;  %s3006_s21 = smov (!%p406_p2, %s1879_s21), 7  ;;  %1996 = vmatprep.subr.mxu1 %v550_v4  ;;  %v1884_v7 = vld [vmem:[#allocation2] ss:$0 sm:$0xff]  ;;  %v1914_v50 = vld [vmem:[%s2939_s6 + $0x28] sm:$0xff]  ;;  %s1924_s27 = sld [smem:[#allocation5 + $0x3]] }
  0x30   : > { %1987 = vmatpush3.msra.mxu0 %v1885_v1  ;;  %s1880_s18 = sshll.u32 %s3006_s21, 3  ;;  %1997 = vmatpush3.msra.mxu1 %v550_v4  ;;  %v2327_v20 = vand.u32 31, %v2323_v11  ;;  %v421_v25 = vadd.s32 24, %v2323_v11  ;;  %vm512_vm1 = vcmp.lt.s32.totalorder %v2323_v11, 1  ;;  %v1895_v28 = vld [vmem:[%s2936_s3 + $0x20] sm:$0xff]  ;;  %vm533_vm2 = vcmp.lt.s32.totalorder %v2323_v11, 7 }
  0x31   : > { %2004 = vmatprep.subr.mxu0 %v1896_v3  ;;  %s2318_s12 = scalar_lea.vmem %s2933_s0, %s1880_s18  ;;  %2014 = vmatprep.subr.mxu1 %v1904_v47  ;;  %v904_v51 = vld [vmem:[%s2939_s6] sm:$0xff]  ;;  %s1925_s28 = sld [smem:[#allocation5 + $0x83]]  ;;  %vm1470_vm9 = vcmp.lt.s32.totalorder %v2323_v11, 3  ;;  %vm1515_vm10 = vcmp.lt.s32.totalorder %v2323_v11, 2  ;;  %vm1648_vm11 = vcmp.lt.s32.totalorder %v2323_v11, 6  ;;  %vm1693_vm13 = vcmp.lt.s32.totalorder %v2323_v11, 5 }
  0x32   : > { %v478_v8 = vld [vmem:[%s2318_s12] sm:$0xff]  ;;  %v479_v9 = vld [vmem:[%s2318_s12 + $0x8] sm:$0xff]  ;;  %v480_v10 = vld [vmem:[%s2318_s12 + $0x10] sm:$0xff]  ;;  %vm470_vm3 = vcmp.ne.s32.totalorder %v2327_v20, 0  ;;  %v2339_v35 = vand.u32 31, %v421_v25  ;;  %s1483_s29 = sld [smem:[#allocation5]] }
  0x33   : > { %v489_v12 = vmul.f32 %v1883_v6, %v478_v8  ;;  %v490_v13 = vmul.f32 %v1883_v6, %v479_v9  ;;  %v491_v14 = vmul.f32 %v1883_v6, %v480_v10  ;;  %v481_v15 = vld [vmem:[%s2318_s12 + $0x18] sm:$0xff]  ;;  %v1901_v60 = vld [vmem:[%s2937_s4] ss:$0 sm:$0xff]  ;;  %s1927_s30 = sld [smem:[#allocation5 + $0x1]]  ;;  %vm1499_vm12 = vcmp.ge.s32.totalorder %v2327_v20, 3 }
  0x34   : > { %v492_v16 = vmul.f32 %v1883_v6, %v481_v15  ;;  %vm477_vm4 = vcmp.ne.s32.totalorder %v2339_v35, 31  ;;  %s1929_s13 = sld [smem:[#allocation5 + $0x2]]  ;;  %vm1544_vm14 = vcmp.ge.s32.totalorder %v2327_v20, 2  ;;  %vm1588_vm15 = vcmp.ge.s32.totalorder %v2327_v20, 1 }
  0x35   : > { %v500_v17 = vadd.f32 %v1884_v7, %v489_v12  ;;  %v501_v18 = vadd.f32 %v1884_v7, %v490_v13  ;;  %v502_v19 = vadd.f32 %v1884_v7, %v491_v14  ;;  %s1931_s14 = sld [smem:[#allocation5 + $0x4]] }
  0x36   : > { %v503_v21 = vadd.f32 %v1884_v7, %v492_v16  ;;  %s1933_s15 = sld [smem:[#allocation5 + $0x5]] }
  0x37   : > { %v504_v22 = vmax.f32 %v500_v17, 0.0  ;;  %v505_v23 = vmax.f32 %v501_v18, 0.0  ;;  %v506_v24 = vmax.f32 %v502_v19, 0.0  ;;  %s1935_s16 = sld [smem:[#allocation5 + $0x6]] }
  0x38   : > { %v507_v26 = vmax.f32 %v503_v21, 0.0  ;;  %s1926_s19 = sld [smem:[#allocation5 + $0x80]] }
  0x39   : > { %1988 = vmatprep.mubr.msk.f32.mxu0 %vm555_vm0, %v504_v22  ;;  %v508_v27 = vrot.slane %v504_v22, 7  ;;  %v509_v29 = vrot.slane %v505_v23, 7  ;;  %v510_v30 = vrot.slane %v506_v24, 7  ;;  %v529_v32 = vrot.slane %v504_v22, 1  ;;  %s1928_s22 = sld [smem:[#allocation5 + $0x81]] }
  0x3a   : > { %1989 = vmatmul.mubr.msk.f32.vlgmr.msra.gmra.mxu0 %vm555_vm0, %v505_v23  ;;  %v511_v31 = vrot.slane %v507_v26, 7  ;;  %v530_v33 = vrot.slane %v505_v23, 1  ;;  %v531_v34 = vrot.slane %v506_v24, 1  ;;  %v532_v39 = vrot.slane %v507_v26, 1  ;;  %v1913_v23 = vld [vmem:[%s2939_s6 + $0x20] sm:$0xff]  ;;  %s1930_s23 = sld [smem:[#allocation5 + $0x82]] }
  0x3b   : > { %2005 = vmatpush3.msra.mxu0 %v1896_v3  ;;  %1991 = vmatprep.mubr.msk.f32.mxu0 %vm555_vm0, %v506_v24  ;;  %v515_v37 = vsel %vm512_vm1, %v508_v27, %v509_v29  ;;  %v514_v41 = vsel %vm512_vm1, %v509_v29, %v510_v30  ;;  %v1902_v3 = vld [vmem:[%s2938_s5] ss:$0 sm:$0xff]  ;;  %s1932_s20 = sld [smem:[#allocation5 + $0x84]] }
  0x3c   : > { %v516_v36 = vsel %vm512_vm1, %v511_v31, %v508_v27  ;;  %2006 = vmatprep.subr.mxu0 %v1895_v28  ;;  %v536_v38 = vsel %vm533_vm2, %v529_v32, %v530_v33  ;;  %v535_v42 = vsel %vm533_vm2, %v530_v33, %v531_v34  ;;  %v513_v43 = vsel %vm512_vm1, %v510_v30, %v511_v31  ;;  %s1934_s24 = sld [smem:[#allocation5 + $0x85]] }
  0x3d   : > { %v525_v40 = vsel %vm470_vm3, %v516_v36, 0.0  ;;  %2007 = vmatpush3.msra.mxu0 %v1895_v28  ;;  %v534_v44 = vsel %vm533_vm2, %v531_v34, %v532_v39  ;;  %v537_v45 = vsel %vm533_vm2, %v532_v39, %v529_v32  ;;  %s1936_s25 = sld [smem:[#allocation5 + $0x86]] }
  0x3e   : > { %1998 = vmatprep.mubr.msk.f32.mxu1 %vm555_vm0, %v525_v40  ;;  %1992 = vmatmul.mubr.msk.f32.gmra.mxu0 %vm555_vm0, %v507_v26  ;;  %v549_v46 = vsel %vm477_vm4, %v537_v45, 0.0  ;;  %v2173_v45 = vmov 0.0  }
  0x3f   : > { %1999 = vmatmul.mubr.msk.f32.vlgmr.msra.gmra.mxu1 %vm555_vm0, %v515_v37  ;;  %2008 = vmatprep.mubr.msk.f32.mxu0 %vm555_vm0, %v536_v38 }
  0x40   : > { %2001 = vmatprep.mubr.msk.f32.mxu1 %vm555_vm0, %v514_v41  ;;  %2015 = vmatpush3.msra.mxu1 %v1904_v47  ;;  %v1324_v47 = vld [vmem:[%s2942_s9] sm:$0x3] }
  0x41   : > { %2016 = vmatprep.subr.mxu1 %v1903_v48  ;;  %2024 = vmatprep.subr.mxu0 %v905_v49 }
  0x42   : > { %2009 = vmatmul.mubr.msk.f32.vlgmr.msra.gmra.mxu0 %vm555_vm0, %v535_v42  ;;  %2017 = vmatpush3.msra.mxu1 %v1903_v48 }
  0x43   : > { %2002 = vmatmul.mubr.msk.f32.gmra.mxu1 %vm555_vm0, %v513_v43  ;;  %2011 = vmatprep.mubr.msk.f32.mxu0 %vm555_vm0, %v534_v44  ;;  %v1249_v44 = vld [vmem:[%s2941_s8 + $0x8] sm:$0xff] }
  0x44   : > { %2025 = vmatpush3.msra.mxu0 %v905_v49  ;;  %2034 = vmatprep.subr.mxu1 %v1914_v50 }
  0x45   : > { %2026 = vmatprep.subr.mxu0 %v904_v51 }
  0x46   : > { %2012 = vmatmul.mubr.msk.f32.gmra.mxu0 %vm555_vm0, %v549_v46  ;;  %v1248_v46 = vld [vmem:[%s2941_s8] sm:$0xff] }
  0x47   : > { %2027 = vmatpush3.msra.mxu0 %v904_v51 }
  0x48   : > { %2044 = vmatprep.subr.mxu0 %v2173_v45 }
  0xfa   : > { %v1990_v52 = vpop.f32.mrf.mxu0 }
  0xfc   : > { %v634_v53 = vpop.f32.mrf.mxu0 }
  0xfe   : > { %v1993_v54 = vpop.f32.mrf.mxu0 }
  0xff   : > { %v2000_v55 = vpop.f32.mrf.mxu1 }
 0x100   : > { %v644_v56 = vpop.f32.mrf.mxu0  ;;  %v737_v57 = vadd.f32 %v2000_v55, %v1990_v52 }
 0x101   : > { %v731_v58 = vpop.f32.mrf.mxu1 }
 0x102   : > { %v2010_v59 = vpop.f32.mrf.mxu0  ;;  %v732_v61 = vadd.f32 %v731_v58, %v634_v53  ;;  %v1919_v58 = vld [vmem:[%s2940_s7] ss:$0 sm:$0xff] }
 0x103   : > { %v2003_v62 = vpop.f32.mrf.mxu1  ;;  %v851_v63 = vadd.f32 %v2010_v59, %v737_v57 }
 0x104   : > { %v831_v0 = vpop.f32.mrf.mxu0  ;;  %v747_v1 = vadd.f32 %v2003_v62, %v1993_v54 }
 0x105   : > { %v862_v2 = vmul.f32 %v1901_v60, %v851_v63  ;;  %v741_v4 = vpop.f32.mrf.mxu1  ;;  %v850_v5 = vadd.f32 %v831_v0, %v732_v61 }
 0x106   : > { %v2013_v6 = vpop.f32.mrf.mxu0  ;;  %v742_v7 = vadd.f32 %v741_v4, %v644_v56 }
 0x107   : > { %v861_v8 = vmul.f32 %v1901_v60, %v850_v5  ;;  %v853_v9 = vadd.f32 %v2013_v6, %v747_v1  ;;  %v873_v10 = vadd.f32 %v1902_v3, %v862_v2 }
 0x108   : > { %v841_v12 = vpop.f32.mrf.mxu0 }
 0x109   : > { %v872_v13 = vadd.f32 %v1902_v3, %v861_v8  ;;  %v864_v14 = vmul.f32 %v1901_v60, %v853_v9  ;;  %v852_v15 = vadd.f32 %v841_v12, %v742_v7  ;;  %v877_v19 = vmax.f32 %v873_v10, 0.0 }
 0x10b   : > { %v876_v16 = vmax.f32 %v872_v13, 0.0  ;;  %v875_v17 = vadd.f32 %v1902_v3, %v864_v14  ;;  %v863_v18 = vmul.f32 %v1901_v60, %v852_v15  ;;  %v893_v28 = vrot.slane %v877_v19, 1 }
 0x10c   : > { %v881_v29 = vrot.slane %v877_v19, 7 }
 0x10d   : > { %v879_v21 = vmax.f32 %v875_v17, 0.0  ;;  %v874_v22 = vadd.f32 %v1902_v3, %v863_v18  ;;  %2018 = vmatprep.mubr.msk.f32.mxu1 %vm555_vm0, %v876_v16  ;;  %v892_v24 = vrot.slane %v876_v16, 1  ;;  %v880_v26 = vrot.slane %v876_v16, 7 }
 0x10e   : > { %2019 = vmatmul.mubr.msk.f32.vlgmr.msra.gmra.mxu1 %vm555_vm0, %v877_v19 }
 0x10f   : > { %v878_v25 = vmax.f32 %v874_v22, 0.0  ;;  %2035 = vmatpush3.msra.mxu1 %v1914_v50  ;;  %v883_v27 = vrot.slane %v879_v21, 7  ;;  %v898_v34 = vsel %vm533_vm2, %v892_v24, %v893_v28  ;;  %v895_v36 = vrot.slane %v879_v21, 1 }
 0x110   : > { %2036 = vmatprep.subr.mxu1 %v1913_v23  ;;  %v886_v37 = vsel %vm512_vm1, %v880_v26, %v881_v29 }
 0x111   : > { %v894_v30 = vrot.slane %v878_v25, 1  ;;  %2021 = vmatprep.mubr.msk.f32.mxu1 %vm555_vm0, %v878_v25  ;;  %2037 = vmatpush3.msra.mxu1 %v1913_v23  ;;  %v887_v31 = vsel %vm512_vm1, %v883_v27, %v880_v26  ;;  %v882_v32 = vrot.slane %v878_v25, 7  ;;  %v899_v41 = vsel %vm533_vm2, %v895_v36, %v892_v24 }
 0x112   : > { %2022 = vmatmul.mubr.msk.f32.gmra.mxu1 %vm555_vm0, %v879_v21  ;;  %v888_v33 = vsel %vm470_vm3, %v887_v31, 0.0  ;;  %v903_v43 = vsel %vm477_vm4, %v899_v41, 0.0  ;;  %2051 = vmatprep.subr.mxu1 %v2173_v45  ;;  %vm1635_vm3 = vcmp.lt.s32.totalorder %v2339_v35, 31  ;;  %vm1680_vm4 = vcmp.lt.s32.totalorder %v2339_v35, 30 }
 0x113   : > { %2028 = vmatprep.mubr.msk.f32.mxu0 %vm555_vm0, %v888_v33  ;;  %2038 = vmatprep.mubr.msk.f32.mxu1 %vm555_vm0, %v898_v34  ;;  %v885_v38 = vsel %vm512_vm1, %v881_v29, %v882_v32  ;;  %v897_v39 = vsel %vm533_vm2, %v893_v28, %v894_v30  ;;  %v896_v40 = vsel %vm533_vm2, %v894_v30, %v895_v36 }
 0x114   : > { %2029 = vmatmul.mubr.msk.f32.vlgmr.msra.gmra.mxu0 %vm555_vm0, %v886_v37  ;;  %v884_v42 = vsel %vm512_vm1, %v882_v32, %v883_v27 }
 0x115   : > { %2031 = vmatprep.mubr.msk.f32.mxu0 %vm555_vm0, %v885_v38  ;;  %2045 = vmatpush3.msra.mxu0 %v1249_v44 }
 0x116   : > { %2039 = vmatmul.mubr.msk.f32.vlgmr.msra.gmra.mxu1 %vm555_vm0, %v897_v39  ;;  %2046 = vmatprep.subr.mxu0 %v2173_v45 }
 0x117   : > { %2041 = vmatprep.mubr.msk.f32.mxu1 %vm555_vm0, %v896_v40  ;;  %2047 = vmatpush3.msra.mxu0 %v1248_v46 }
 0x118   : > { %2032 = vmatmul.mubr.msk.f32.gmra.mxu0 %vm555_vm0, %v884_v42  ;;  %2052 = vmatpush3.msk.msra.mxu1 %vm1329_vm6, %v1324_v47 }
 0x119   : > { %2048 = vmatprep.mubr.msk.f32.mxu0 %vm2174_vm5, %v2173_v45 }
 0x11a   : > { %2042 = vmatmul.mubr.msk.f32.gmra.mxu1 %vm555_vm0, %v903_v43 }
 0x11b   : > { %2053 = vmatprep.mubr.msk.f32.mxu1 %vm2174_vm5, %v2173_v45 }
 0x1ce   : > { %v2020_v48 = vpop.f32.mrf.mxu1 }
 0x1d0   : > { %v987_v49 = vpop.f32.mrf.mxu1 }
 0x1d2   : > { %v2023_v50 = vpop.f32.mrf.mxu1 }
 0x1d4   : > { %v997_v51 = vpop.f32.mrf.mxu1  ;;  %v2030_v52 = vpop.f32.mrf.mxu0 }
 0x1d5   : > { %v1090_v53 = vadd.f32 %v2030_v52, %v2020_v48 }
 0x1d6   : > { %v1084_v54 = vpop.f32.mrf.mxu0  ;;  %v2040_v55 = vpop.f32.mrf.mxu1 }
 0x1d7   : > { %v1085_v56 = vadd.f32 %v1084_v54, %v987_v49  ;;  %v1204_v57 = vadd.f32 %v2040_v55, %v1090_v53 }
 0x1d8   : > { %v2033_v59 = vpop.f32.mrf.mxu0  ;;  %v1184_v60 = vpop.f32.mrf.mxu1 }
 0x1d9   : > { %v1100_v61 = vadd.f32 %v2033_v59, %v2023_v50  ;;  %v1203_v62 = vadd.f32 %v1184_v60, %v1085_v56  ;;  %v1215_v1 = vadd.f32 %v1919_v58, %v1204_v57  ;;  %v1415_v50 = vsub.s32 0, %v2323_v11 }
 0x1da   : > { %v1094_v63 = vpop.f32.mrf.mxu0  ;;  %v2043_v0 = vpop.f32.mrf.mxu1 }
 0x1db   : > { %v1214_v2 = vadd.f32 %v1919_v58, %v1203_v62  ;;  %v1095_v3 = vadd.f32 %v1094_v63, %v997_v51  ;;  %v1206_v4 = vadd.f32 %v2043_v0, %v1100_v61  ;;  %v1219_v9 = vsel %vm555_vm0, %v1215_v1, 0.0 }
 0x1dc   : > { %v1194_v5 = vpop.f32.mrf.mxu1  ;;  %v1234_v14 = vsel %vm555_vm0, %v1215_v1, -inf }
 0x1dd   : > { %v1218_v6 = vsel %vm555_vm0, %v1214_v2, 0.0  ;;  %v1205_v7 = vadd.f32 %v1194_v5, %v1095_v3  ;;  %v1217_v8 = vadd.f32 %v1919_v58, %v1206_v4  ;;  %v1233_v10 = vsel %vm555_vm0, %v1214_v2, -inf }
 0x1de   : > { %v1220_v13 = vadd.f32 %v1219_v9, %v1218_v6  ;;  %v1237_v18 = vmax.f32 %v1233_v10, %v1234_v14  ;;  %v2473_v4 = vstv %s1924_s27  ;;  %v2477_v6 = vstv %s1925_s28  ;;  %s415_s28 = scalar_lea.vmem %s2944_s11, %s1880_s18 }
 0x1df   : > { %v1216_v12 = vadd.f32 %v1919_v58, %v1205_v7  ;;  %v1236_v15 = vsel %vm555_vm0, %v1217_v8, -inf  ;;  %v1223_v22 = vsel %vm555_vm0, %v1217_v8, 0.0  ;;  %v2480_v7 = vstv %s1483_s29 }
 0x1e0   : > { %v2484_v9 = vstv %s1927_s30  ;;  %v2486_v10 = vstv %s1929_s13  ;;  %v2492_v14 = vstv %s1928_s22 }
 0x1e1   : > { %v1221_v16 = vsel %vm555_vm0, %v1216_v12, 0.0  ;;  %v1235_v17 = vsel %vm555_vm0, %v1216_v12, -inf }
 0x1e2   : > { %v1222_v19 = vadd.f32 %v1221_v16, %v1220_v13  ;;  %v1238_v21 = vmax.f32 %v1235_v17, %v1236_v15  ;;  %v2490_v13 = vstv %s1926_s19  ;;  %v2494_v15 = vstv %s1933_s15 }
 0x1e3   : > { %v2496_v16 = vstv %s1935_s16 }
 0x1e4   : > { %v1224_v23 = vadd.f32 %v1223_v22, %v1222_v19  ;;  %v1239_v24 = vmax.f32 %v1237_v18, %v1238_v21  ;;  %v2501_v19 = vstv %s1930_s23  ;;  %v2503_v21 = vstv %s1932_s20 }
 0x1e5   : > { %v2505_v22 = vstv %s1934_s24 }
 0x1e6   : > { %v1225_v25 = vrot.slane %v1224_v23, 4  ;;  %v1240_v26 = vrot.slane %v1239_v24, 4 }
 0x1e8   : > { %v1226_v27 = vadd.f32 %v1225_v25, %v1224_v23  ;;  %v1241_v28 = vmax.f32 %v1239_v24, %v1240_v26  ;;  %v2507_v23 = vstv %s1936_s25 }
 0x1ea   : > { %v1227_v29 = vrot.slane %v1226_v27, 2  ;;  %v1242_v30 = vrot.slane %v1241_v28, 2 }
 0x1ec   : > { %v1228_v31 = vadd.f32 %v1227_v29, %v1226_v27  ;;  %v1243_v32 = vmax.f32 %v1241_v28, %v1242_v30 }
 0x1ee   : > { %v1229_v33 = vrot.slane %v1228_v31, 1  ;;  %v1244_v34 = vrot.slane %v1243_v32, 1 }
 0x1f0   : > { %v1230_v36 = vadd.f32 %v1229_v33, %v1228_v31  ;;  %v1245_v38 = vmax.f32 %v1243_v32, %v1244_v34 }
 0x1f2   : > { %v1232_v37 = vmul.f32 0.03125, %v1230_v36 }
 0x1f4   : > { %v1247_v39 = vsel %vm1246_vm7, %v1232_v37, %v1245_v38 }
 0x1f5   : > { %2049 = vmatmul.mubr.msk.f32.vlgmr.msra.gmra.mxu0 %vm555_vm0, %v1247_v39 }
 0x2b5   : > { %v1319_v40 = vpop.f32.mrf.mxu0 }
 0x2b6   : > { %v1323_v41 = vmax.f32 %v1319_v40, 0.0 }
 0x2b7   : > { %v2050_v42 = vpop.f32.mrf.mxu0 }
 0x2b8   : > { %2054 = vmatmul.mubr.msk.f32.vlgmr.msra.gmra.mxu1 %vm1325_vm8, %v1323_v41 }
 0x378   : > { %v1399_v43 = vpop.f32.mrf.mxu1 }
 0x379   : > { %v1404_v44 = vrot.slane %v1399_v43, 1 }
 0x37a   : > { %v2055_v45 = vpop.f32.mrf.mxu1 }
 0x37b   : > { %v1406_v46 = vadd.f32 %v1404_v44, %v1399_v43 }
 0x37d   : > { %v1923_v47 = vmul.f32 -1.442695, %v1406_v46 }
 0x37f   : > { %2090 = vpow2.f32 %v1923_v47 }
 0x38c   : > { %v2091_v48 = vpop.eup %2090 }
 0x38d   : > { %v1410_v49 = vadd.f32 1.0, %v2091_v48 }
 0x38f   : > { %2092 = vrcp.f32 %v1410_v49 }
 0x39c   : > { %v2093_v51 = vpop.eup %2092 }
 0x39d   : > { %v1416_v52 = vrot.slane %v2093_v51, %v1415_v50 }
 0x39f   : > { %v2449_v53 = vmul.f32 %v1416_v52, %v1215_v1  ;;  %v2451_v54 = vmul.f32 %v1416_v52, %v1214_v2  ;;  %v2457_v57 = vmul.f32 %v1416_v52, %v1217_v8  ;;  %v2463_v60 = vmul.f32 %v1416_v52, %v1216_v12 }
 0x3a0   : > { %v2175_v1 = vmov 0   ;;  %v2488_v12 = vstv %s1931_s14 }
 0x3a1   : > { %v1424_v55 = vsel %vm555_vm0, %v2449_v53, 0.0  ;;  %v1421_v56 = vsel %vm555_vm0, %v2451_v54, 0.0  ;;  %v1438_v58 = vsel %vm555_vm0, %v2451_v54, -inf  ;;  %v1430_v59 = vsel %vm555_vm0, %v2457_v57, 0.0  ;;  %2088 = vset.pattern.permute.xlu0 %v2175_v1  ;;  %2089 = vset.pattern.permute.xlu1 %v2175_v1 }
 0x3a2   : > { %1425 = vadd.xlane.f32.xlu1 %v1424_v55  ;;  %1422 = vadd.xlane.f32.xlu0 %v1421_v56  ;;  %v1427_v61 = vsel %vm555_vm0, %v2463_v60, 0.0  ;;  %v1447_v62 = vsel %vm555_vm0, %v2457_v57, -inf  ;;  %v1444_v63 = vsel %vm555_vm0, %v2463_v60, -inf  ;;  %v1441_v0 = vsel %vm555_vm0, %v2449_v53, -inf }
 0x3a6   : > { %1439 = vmax.xlane.f32.xlu1 %v1438_v58  ;;  %1431 = vadd.xlane.f32.xlu0 %v1430_v59 }
 0x3aa   : > { %1428 = vadd.xlane.f32.xlu1 %v1427_v61  ;;  %1448 = vmax.xlane.f32.xlu0 %v1447_v62 }
 0x3ae   : > { %1445 = vmax.xlane.f32.xlu1 %v1444_v63  ;;  %1442 = vmax.xlane.f32.xlu0 %v1441_v0 }
 0x42b   : > { %v1426_v2 = vpop.xlane.xlu1 %1425  ;;  %v1423_v3 = vpop.xlane.xlu0 %1422 }
 0x42c   : > { %v2475_v5 = vmul.f32 0.0625, %v1426_v2  ;;  %v2482_v8 = vmul.f32 0.0625, %v1423_v3 }
 0x42e   : > { %v2950_v24 = vrot.slane %v2475_v5, 5  ;;  %v1466_v30 = vrot.slane %v2482_v8, 5  ;;  %v2948_v31 = vrot.slane %v2482_v8, 6  ;;  %v2949_v32 = vrot.slane %v2482_v8, 7 }
 0x42f   : > { %v2498_v17 = vpop.xlane.xlu1 %1439  ;;  %v1432_v18 = vpop.xlane.xlu0 %1431  ;;  %v2953_v33 = vrot.slane %v2482_v8, 1  ;;  %v2954_v34 = vrot.slane %v2482_v8, 2  ;;  %v2961_v37 = vrot.slane %v2482_v8, 3  ;;  %v1452_v38 = vmul.f32 %v2473_v4, %v2482_v8 }
 0x430   : > { %v1458_v36 = vmul.f32 %v2477_v6, %v2498_v17  ;;  %v2951_v39 = vrot.slane %v2498_v17, 5  ;;  %v2526_v40 = vmul.f32 0.0625, %v1432_v18  ;;  %v2952_v42 = vrot.slane %v2498_v17, 6 }
 0x431   : > { %v2959_v43 = vrot.slane %v2498_v17, 7  ;;  %v2958_v44 = vrot.slane %v2498_v17, 1  ;;  %v2957_v45 = vrot.slane %v2498_v17, 2  ;;  %v2960_v47 = vrot.slane %v2498_v17, 3 }
 0x432   : > { %v1469_v48 = vrot.slane %v2526_v40, 5  ;;  %v1514_v49 = vrot.slane %v2526_v40, 6  ;;  %v1462_v51 = vadd.f32 %v1458_v36, %v1452_v38  ;;  %v2964_v52 = vrot.slane %v2526_v40, 7 }
 0x433   : > { %v1429_v41 = vpop.xlane.xlu1 %1428  ;;  %v2533_v46 = vpop.xlane.xlu0 %1448  ;;  %v2545_v55 = vmul.f32 %v2473_v4, %v2475_v5  ;;  %v2551_v56 = vsel %vm1470_vm9, %v1466_v30, %v2950_v24  ;;  %v2956_v58 = vrot.slane %v2526_v40, 1  ;;  %v2955_v63 = vrot.slane %v2526_v40, 2 }
 0x434   : > { %v2539_v50 = vmul.f32 0.0625, %v1429_v41  ;;  %v1461_v59 = vmul.f32 %v2477_v6, %v2533_v46  ;;  %v1478_v61 = vrot.slane %v2533_v46, 5  ;;  %v1523_v62 = vrot.slane %v2533_v46, 6 }
 0x435   : > { %v2963_v0 = vrot.slane %v2526_v40, 3  ;;  %v1474_v1 = vsel %vm1470_vm9, %v1469_v48, %v1466_v30  ;;  %v1519_v2 = vsel %vm1515_vm10, %v1514_v49, %v2948_v31  ;;  %v1455_v30 = vmul.f32 %v2473_v4, %v2526_v40 }
 0x436   : > { %v1468_v3 = vrot.slane %v2539_v50, 5  ;;  %v1513_v18 = vrot.slane %v2539_v50, 6  ;;  %v1563_v28 = vsel %vm512_vm1, %v2964_v52, %v2949_v32  ;;  %v1485_v27 = vmul.f32 %v2480_v7, %v1474_v1 }
 0x437   : > { %v1530_v26 = vmul.f32 %v2484_v9, %v1519_v2  ;;  %v1482_v31 = vsel %vm1470_vm9, %v1478_v61, %v2951_v39  ;;  %v1527_v25 = vsel %vm1515_vm10, %v1523_v62, %v2952_v42  ;;  %v1567_v2 = vrot.slane %v2533_v46, 7  ;;  %v2614_v29 = vpop.xlane.xlu1 %1445 }
 0x438   : > { %v1491_v32 = vmul.f32 %v2490_v13, %v1482_v31  ;;  %v1536_v1 = vmul.f32 %v2492_v14, %v1527_v25  ;;  %v1611_v24 = vrot.slane %v2533_v46, 1  ;;  %v1607_v39 = vsel %vm533_vm2, %v2956_v58, %v2953_v33 }
 0x439   : > { %v1652_v31 = vsel %vm1648_vm11, %v2955_v63, %v2954_v34  ;;  %v1656_v25 = vrot.slane %v2533_v46, 2  ;;  %v2962_v42 = vrot.slane %v2533_v46, 3  ;;  %v1697_v33 = vsel %vm1693_vm13, %v2963_v0, %v2961_v37 }
 0x43a   : > { %v1495_v41 = vadd.f32 %v1491_v32, %v1485_v27  ;;  %v1571_v38 = vsel %vm512_vm1, %v1567_v2, %v2959_v43  ;;  %v1615_v34 = vsel %vm533_vm2, %v1611_v24, %v2958_v44  ;;  %v1540_v63 = vadd.f32 %v1536_v1, %v1530_v26 }
 0x43b   : > { %v1580_v58 = vmul.f32 %v2501_v19, %v1571_v38  ;;  %v1660_v36 = vsel %vm1648_vm11, %v1656_v25, %v2957_v45  ;;  %v1705_v27 = vsel %vm1693_vm13, %v2962_v42, %v2960_v47  ;;  %v1627_v26 = vmul.f32 %v2503_v21, %v1615_v34 }
 0x43c   : > { %v1503_v32 = vsel %vm1499_vm12, %v1495_v41, 0.0  ;;  %v1672_v38 = vmul.f32 %v2505_v22, %v1660_v36  ;;  %v1460_v1 = vmul.f32 %v2477_v6, %v2614_v29  ;;  %v1574_v45 = vmul.f32 %v2486_v10, %v1563_v28 }
 0x43d   : > { %v1621_v44 = vmul.f32 %v2488_v12, %v1607_v39  ;;  %v1666_v43 = vmul.f32 %v2494_v15, %v1652_v31  ;;  %v1454_v47 = vmul.f32 %v2473_v4, %v2539_v50  ;;  %v1507_v37 = vadd.f32 %v1503_v32, %v1462_v51 }
 0x43e   : > { %v1717_v41 = vmul.f32 %v2507_v23, %v1705_v27  ;;  %v1471_v34 = vsel %vm1470_vm9, %v1468_v3, %v1469_v48  ;;  %v1477_v36 = vrot.slane %v2614_v29, 5  ;;  %v1711_v28 = vmul.f32 %v2496_v16, %v1697_v33 }
 0x43f   : > { %v1465_v39 = vadd.f32 %v1461_v59, %v1455_v30  ;;  %v1548_v31 = vsel %vm1544_vm14, %v1540_v63, 0.0  ;;  %v1584_v42 = vadd.f32 %v1580_v58, %v1574_v45  ;;  %v1631_v4 = vadd.f32 %v1627_v26, %v1621_v44 }
 0x440   : > { %v1676_v0 = vadd.f32 %v1672_v38, %v1666_v43  ;;  %v2663_v52 = vadd.f32 %v1460_v1, %v1454_v47  ;;  %v1479_v51 = vsel %vm1470_vm9, %v1477_v36, %v1478_v61  ;;  %v1488_v48 = vmul.f32 %v2480_v7, %v1471_v34 }
 0x441   : > { %v1494_v27 = vmul.f32 %v2490_v13, %v1479_v51  ;;  %v1516_v33 = vsel %vm1515_vm10, %v1513_v18, %v1514_v49  ;;  %v1522_v43 = vrot.slane %v2614_v29, 6  ;;  %v1552_v44 = vadd.f32 %v1548_v31, %v1507_v37 }
 0x442   : > { %v2678_v45 = vadd.f32 %v1717_v41, %v1711_v28  ;;  %v1566_v47 = vrot.slane %v2614_v29, 7  ;;  %v1610_v58 = vrot.slane %v2614_v29, 1  ;;  %v1592_v59 = vsel %vm1588_vm15, %v1584_v42, 0.0 }
 0x443   : > { %v1498_v61 = vadd.f32 %v1494_v27, %v1488_v48  ;;  %v1524_v49 = vsel %vm1515_vm10, %v1522_v43, %v1523_v62  ;;  %v2970_v63 = vrot.slane %v2526_v40, 7  ;;  %v2971_v37 = vrot.slane %v2539_v50, 7 }
 0x444   : > { %v1533_v32 = vmul.f32 %v2484_v9, %v1516_v33  ;;  %v1539_v20 = vmul.f32 %v2492_v14, %v1524_v49  ;;  %v1568_v42 = vsel %vm512_vm1, %v1566_v47, %v1567_v2  ;;  %v1612_v62 = vsel %vm533_vm2, %v1610_v58, %v1611_v24 }
 0x445   : > { %v1560_v30 = vsel %vm512_vm1, %v2971_v37, %v2970_v63  ;;  %v1510_v26 = vadd.f32 %v1498_v61, %v1465_v39  ;;  %v1583_v38 = vmul.f32 %v2501_v19, %v1568_v42  ;;  %v2972_v1 = vrot.slane %v2526_v40, 1 }
 0x446   : > { %v2973_v41 = vrot.slane %v2539_v50, 1  ;;  %v1655_v28 = vrot.slane %v2614_v29, 2  ;;  %v1543_v31 = vadd.f32 %v1539_v20, %v1533_v32  ;;  %v1577_v2 = vmul.f32 %v2486_v10, %v1560_v30 }
 0x447   : > { %v1626_v51 = vmul.f32 %v2503_v21, %v1612_v62  ;;  %v1700_v48 = vrot.slane %v2614_v29, 3  ;;  %v1639_v24 = vsel %vm1635_vm3, %v1631_v4, 0.0  ;;  %v2974_v39 = vrot.slane %v2526_v40, 2 }
 0x448   : > { %v1604_v34 = vsel %vm533_vm2, %v2973_v41, %v2972_v1  ;;  %v2975_v27 = vrot.slane %v2539_v50, 2  ;;  %v1657_v61 = vsel %vm1648_vm11, %v1655_v28, %v1656_v25  ;;  %v2976_v49 = vrot.slane %v2526_v40, 3 }
 0x449   : > { %v2977_v63 = vrot.slane %v2539_v50, 3  ;;  %v1555_v4 = vadd.f32 %v1543_v31, %v1510_v26  ;;  %v1587_v30 = vadd.f32 %v1583_v38, %v1577_v2  ;;  %v1620_v32 = vmul.f32 %v2488_v12, %v1604_v34 }
 0x44a   : > { %v1649_v33 = vsel %vm1648_vm11, %v2975_v27, %v2974_v39  ;;  %v2978_v20 = vrot.slane %v2533_v46, 3  ;;  %v2742_v62 = vadd.f32 %v1592_v59, %v1552_v44  ;;  %v2746_v40 = vsel %vm1680_vm4, %v1676_v0, 0.0 }
 0x44b   : > { %v1694_v37 = vsel %vm1693_vm13, %v2977_v63, %v2976_v49  ;;  %v1671_v25 = vmul.f32 %v2505_v22, %v1657_v61  ;;  %v2979_v26 = vrot.slane %v2475_v5, 5  ;;  %v1599_v38 = vadd.f32 %v1587_v30, %v1555_v4 }
 0x44c   : > { %v1702_v42 = vsel %vm1693_vm13, %v1700_v48, %v2978_v20  ;;  %v2755_v1 = vadd.f32 %v1626_v51, %v1620_v32  ;;  %v1665_v41 = vmul.f32 %v2494_v15, %v1649_v33  ;;  %v2759_v44 = vmul.f32 %v2496_v16, %v1694_v37  ;;  %v1443_v32 = vpop.xlane.xlu0 %1442 }
 0x44d   : > { %v1472_v46 = vsel %vm1470_vm9, %v2979_v26, %v1468_v3  ;;  %v2762_v0 = vmul.f32 %v2507_v23, %v1702_v42  ;;  %v2980_v59 = vrot.slane %v2475_v5, 6  ;;  %v2982_v31 = vrot.slane %v2482_v8, 6 }
 0x44e   : > { %v2983_v51 = vrot.slane %v2475_v5, 7  ;;  %v2984_v39 = vrot.slane %v2482_v8, 7  ;;  %v1486_v33 = vmul.f32 %v2480_v7, %v2551_v56  ;;  %v1487_v61 = vmul.f32 %v2480_v7, %v1472_v46 }
 0x44f   : > { %v1517_v34 = vsel %vm1515_vm10, %v2980_v59, %v1513_v18  ;;  %v2981_v3 = vmov %v2980_v59  ;;  %v2985_v18 = vrot.slane %v2539_v50, 7  ;;  %v2987_v37 = vrot.slane %v2539_v50, 1 }
 0x450   : > { %v1518_v2 = vsel %vm1515_vm10, %v2982_v31, %v2981_v3  ;;  %v1562_v27 = vsel %vm512_vm1, %v2984_v39, %v2983_v51  ;;  %v2986_v49 = vmov %v2983_v51  ;;  %v2988_v4 = vrot.slane %v2475_v5, 1 }
 0x451   : > { %v1561_v63 = vsel %vm512_vm1, %v2986_v49, %v2985_v18  ;;  %v2797_v20 = vadd.f32 %v1671_v25, %v1665_v41  ;;  %v2990_v7 = vrot.slane %v2482_v8, 1  ;;  %v2991_v26 = vrot.slane %v2539_v50, 2 }
 0x452   : > { %v1605_v30 = vsel %vm533_vm2, %v2988_v4, %v2987_v37  ;;  %v2989_v56 = vmov %v2988_v4  ;;  %v2992_v46 = vrot.slane %v2475_v5, 2  ;;  %v2994_v31 = vrot.slane %v2482_v8, 2 }
 0x453   : > { %v1606_v42 = vsel %vm533_vm2, %v2990_v7, %v2989_v56  ;;  %v2817_v41 = vadd.f32 %v1639_v24, %v1599_v38  ;;  %v1531_v51 = vmul.f32 %v2484_v9, %v1518_v2  ;;  %v1532_v39 = vmul.f32 %v2484_v9, %v1517_v34 }
 0x454   : > { %v1650_v59 = vsel %vm1648_vm11, %v2992_v46, %v2991_v26  ;;  %v2993_v3 = vmov %v2992_v46  ;;  %v1575_v18 = vmul.f32 %v2486_v10, %v1562_v27  ;;  %v1576_v49 = vmul.f32 %v2486_v10, %v1561_v63 }
 0x455   : > { %v1651_v25 = vsel %vm1648_vm11, %v2994_v31, %v2993_v3  ;;  %v1618_v37 = vmul.f32 %v2488_v12, %v1606_v42  ;;  %v1619_v4 = vmul.f32 %v2488_v12, %v1605_v30  ;;  %v1476_v56 = vrot.slane %v1443_v32, 5 }
 0x456   : > { %v1663_v7 = vmul.f32 %v2494_v15, %v1651_v25  ;;  %v1664_v26 = vmul.f32 %v2494_v15, %v1650_v59  ;;  %v1459_v24 = vmul.f32 %v2477_v6, %v1443_v32  ;;  %v1521_v38 = vrot.slane %v1443_v32, 6 }
 0x457   : > { %v2995_v2 = vrot.slane %v2539_v50, 3  ;;  %v2996_v9 = vrot.slane %v2475_v5, 3  ;;  %v1480_v10 = vsel %vm1470_vm9, %v1476_v56, %v1477_v36  ;;  %v2997_v12 = vrot.slane %v2498_v17, 5 }
 0x458   : > { %v1565_v27 = vrot.slane %v1443_v32, 7  ;;  %v2999_v50 = vrot.slane %v2482_v8, 3  ;;  %v1493_v42 = vmul.f32 %v2490_v13, %v1480_v10  ;;  %v1525_v36 = vsel %vm1515_vm10, %v1521_v38, %v1522_v43 }
 0x459   : > { %v1695_v34 = vsel %vm1693_vm13, %v2996_v9, %v2995_v2  ;;  %v1481_v15 = vsel %vm1470_vm9, %v2997_v12, %v1476_v56  ;;  %v2998_v6 = vmov %v2996_v9  ;;  %v3000_v46 = vrot.slane %v2498_v17, 6 }
 0x45a   : > { %v1696_v63 = vsel %vm1693_vm13, %v2999_v50, %v2998_v6  ;;  %v1492_v30 = vmul.f32 %v2490_v13, %v1481_v15  ;;  %v1538_v5 = vmul.f32 %v2492_v14, %v1525_v36  ;;  %v1569_v8 = vsel %vm512_vm1, %v1565_v27, %v1566_v47 }
 0x45b   : > { %v1526_v59 = vsel %vm1515_vm10, %v3000_v46, %v1521_v38  ;;  %v3001_v3 = vrot.slane %v2498_v17, 7  ;;  %v1463_v31 = vadd.f32 %v1459_v24, %v2545_v55  ;;  %v1497_v25 = vadd.f32 %v1493_v42, %v1487_v61 }
 0x45c   : > { %v1496_v43 = vadd.f32 %v1492_v30, %v1486_v33  ;;  %v1537_v56 = vmul.f32 %v2492_v14, %v1526_v59  ;;  %v1542_v2 = vadd.f32 %v1538_v5, %v1532_v39  ;;  %v1582_v9 = vmul.f32 %v2501_v19, %v1569_v8 }
 0x45d   : > { %v1570_v13 = vsel %vm512_vm1, %v3001_v3, %v1565_v27  ;;  %v1609_v10 = vrot.slane %v1443_v32, 1  ;;  %v1509_v47 = vadd.f32 %v1497_v25, %v2663_v52  ;;  %v1654_v6 = vrot.slane %v1443_v32, 2 }
 0x45e   : > { %v1581_v38 = vmul.f32 %v2501_v19, %v1570_v13  ;;  %v1508_v12 = vadd.f32 %v1496_v43, %v1463_v31  ;;  %v1541_v15 = vadd.f32 %v1537_v56, %v1531_v51  ;;  %v1586_v36 = vadd.f32 %v1582_v9, %v1576_v49 }
 0x45f   : > { %v1613_v55 = vsel %vm533_vm2, %v1609_v10, %v1610_v58  ;;  %v3002_v14 = vrot.slane %v2498_v17, 1  ;;  %v1554_v19 = vadd.f32 %v1542_v2, %v1509_v47  ;;  %v1708_v51 = vmul.f32 %v2496_v16, %v1696_v63 }
 0x460   : > { %v1585_v50 = vadd.f32 %v1581_v38, %v1575_v18  ;;  %v1553_v61 = vadd.f32 %v1541_v15, %v1508_v12  ;;  %v1625_v52 = vmul.f32 %v2503_v21, %v1613_v55  ;;  %v1658_v18 = vsel %vm1648_vm11, %v1654_v6, %v1655_v28 }
 0x461   : > { %v1614_v33 = vsel %vm533_vm2, %v3002_v14, %v1609_v10  ;;  %v3003_v58 = vrot.slane %v2498_v17, 2  ;;  %v1699_v24 = vrot.slane %v1443_v32, 3  ;;  %v1598_v30 = vadd.f32 %v1586_v36, %v1554_v19  ;;  %v2110_v14 = vld [vmem:[%s2318_s12] sm:$0xff] }
 0x462   : > { %v1624_v39 = vmul.f32 %v2503_v21, %v1614_v33  ;;  %v1597_v27 = vadd.f32 %v1585_v50, %v1553_v61  ;;  %v1629_v46 = vadd.f32 %v1625_v52, %v1619_v4  ;;  %v1670_v21 = vmul.f32 %v2505_v22, %v1658_v18  ;;  %v2111_v61 = vld [vmem:[%s2318_s12 + $0x8] sm:$0xff]  ;;  %v2112_v52 = vld [vmem:[%s2318_s12 + $0x10] sm:$0xff] }
 0x463   : > { %v1659_v49 = vsel %vm1648_vm11, %v3003_v58, %v1654_v6  ;;  %v1703_v63 = vsel %vm1693_vm13, %v1699_v24, %v1700_v48  ;;  %v3004_v28 = vrot.slane %v2498_v17, 3  ;;  %v1709_v3 = vmul.f32 %v2496_v16, %v1695_v34 }
 0x464   : > { %v1628_v42 = vadd.f32 %v1624_v39, %v1618_v37  ;;  %v1669_v59 = vmul.f32 %v2505_v22, %v1659_v49  ;;  %v1641_v8 = vadd.f32 %v1629_v46, %v1597_v27  ;;  %v1642_v37 = vadd.f32 %v2755_v1, %v1598_v30  ;;  %v2113_v49 = vld [vmem:[%s2318_s12 + $0x18] sm:$0xff] }
 0x465   : > { %v1704_v5 = vsel %vm1693_vm13, %v3004_v28, %v1699_v24  ;;  %v1674_v13 = vadd.f32 %v1670_v21, %v1664_v26  ;;  %v1715_v29 = vmul.f32 %v2507_v23, %v1703_v63  ;;  %vm1725_vm1 = vcmp.lt.s32.totalorder %v2339_v35, 29 }
 0x466   : > { %v1640_v32 = vadd.f32 %v1628_v42, %v2742_v62  ;;  %v1714_v4 = vmul.f32 %v2507_v23, %v1704_v5  ;;  %v1673_v22 = vadd.f32 %v1669_v59, %v1663_v7  ;;  %v1688_v17 = vadd.f32 %v2746_v40, %v2817_v41 }
 0x467   : > { %v1720_v11 = vadd.f32 %v2762_v0, %v2759_v44  ;;  %v1687_v48 = vadd.f32 %v2797_v20, %v1642_v37  ;;  %v1686_v1 = vadd.f32 %v1674_v13, %v1641_v8  ;;  %v1719_v43 = vadd.f32 %v1715_v29, %v1709_v3 }
 0x468   : > { %v1685_v62 = vadd.f32 %v1673_v22, %v1640_v32  ;;  %v1718_v31 = vadd.f32 %v1714_v4, %v1708_v51  ;;  %v1729_v16 = vsel %vm1725_vm1, %v2678_v45, 0.0 }
 0x469   : > { %v1732_v25 = vadd.f32 %v1720_v11, %v1687_v48  ;;  %v1731_v26 = vadd.f32 %v1719_v43, %v1686_v1  ;;  %v1733_v23 = vadd.f32 %v1729_v16, %v1688_v17 }
 0x46a   : > { %v1730_v7 = vadd.f32 %v1718_v31, %v1685_v62 }
 0x46b   : > { %v1939_v34 = vmul.f32 -1.442695, %v1732_v25  ;;  %v1938_v56 = vmul.f32 -1.442695, %v1731_v26  ;;  %v1940_v40 = vmul.f32 -1.442695, %v1733_v23 }
 0x46c   : > { %v1937_v35 = vmul.f32 -1.442695, %v1730_v7 }
 0x46d   : > { %2094 = vpow2.f32 %v1939_v34 }
 0x46e   : > { %2096 = vpow2.f32 %v1937_v35 }
 0x46f   : > { %2098 = vpow2.f32 %v1938_v56 }
 0x470   : > { %2100 = vpow2.f32 %v1940_v40 }
 0x47a   : > { %v2095_v44 = vpop.eup %2094 }
 0x47b   : > { %v2097_v0 = vpop.eup %2096  ;;  %v1748_v38 = vadd.f32 1.0, %v2095_v44 }
 0x47c   : > { %v2099_v20 = vpop.eup %2098  ;;  %v1746_v41 = vadd.f32 1.0, %v2097_v0 }
 0x47d   : > { %v1747_v2 = vadd.f32 1.0, %v2099_v20  ;;  %v2101_v45 = vpop.eup %2100 }
 0x47e   : > { %2102 = vrcp.f32 %v1746_v41  ;;  %v1749_v9 = vadd.f32 1.0, %v2101_v45 }
 0x47f   : > { %2104 = vrcp.f32 %v1747_v2 }
 0x480   : > { %2106 = vrcp.f32 %v1748_v38 }
 0x481   : > { %2108 = vrcp.f32 %v1749_v9 }
 0x48b   : > { %v2103_v10 = vpop.eup %2102 }
 0x48c   : > { %v2105_v12 = vpop.eup %2104  ;;  %1760 = vperm.xlu0 %2088, %v2103_v10  }
 0x48d   : > { %1765 = vperm.xlu1 %2089, %v2105_v12   ;;  %v2107_v47 = vpop.eup %2106 }
 0x48e   : > { %v2109_v15 = vpop.eup %2108 }
 0x491   : > { %1770 = vperm.xlu1 %2089, %v2107_v47  }
 0x495   : > { %1775 = vperm.xlu1 %2089, %v2109_v15  }
 0x507   : > { %v1761_v6 = vpop.permute.xlu0 %1760 }
 0x508   : > { %v1778_v50 = vmul.f32 %v1761_v6, %v2451_v54  ;;  %v1766_v36 = vpop.permute.xlu1 %1765 }
 0x509   : > { %v1779_v55 = vmul.f32 %v1766_v36, %v2449_v53 }
 0x50a   : > { %v1782_v33 = vadd.f32 %v2110_v14, %v1778_v50 }
 0x50b   : > { %v1783_v19 = vadd.f32 %v2111_v61, %v1779_v55 }
 0x50c   : > { %1786 = vst.msk [vmem:[%s415_s28] sm:$0xff] %vm555_vm0, %v1782_v33  ;;  %v1771_v39 = vpop.permute.xlu1 %1770 }
 0x50d   : > { %1787 = vst.msk [vmem:[%s415_s28 + $0x8] sm:$0xff] %vm555_vm0, %v1783_v19  ;;  %v1780_v54 = vmul.f32 %v1771_v39, %v2463_v60 }
 0x50f   : > { %v1784_v51 = vadd.f32 %v2112_v52, %v1780_v54 }
 0x510   : > { %v1776_v18 = vpop.permute.xlu1 %1775 }
 0x511   : > { %1788 = vst.msk [vmem:[%s415_s28 + $0x10] sm:$0xff] %vm555_vm0, %v1784_v51  ;;  %v1781_v58 = vmul.f32 %v1776_v18, %v2457_v57 }
 0x513   : > { %v1785_v53 = vadd.f32 %v2113_v49, %v1781_v58 }
 0x515   : > { %1789 = vst.msk [vmem:[%s415_s28 + $0x18] sm:$0xff] %vm555_vm0, %v1785_v53 }
 0x516 PF: > { %s23_s17 = sadd.s32 1, %s2169_s17  }
 0x517   : > { %p20_p3 = scmp.ge.s32.totalorder %s23_s17, 4  }
 0x519   :  { %22 = sbr.rel (!%p20_p3) target bundleno = 2 (0x2), region = 108 }
 0x51e   :  { %1812 = vsyncpa [#allocation3], 1 }
 0x51f   :  { %1814 = vsyncpa [#allocation3 + $0x1], 1 }
 0x520   :  { %1815 = vsyncpa [#allocation4], 1 }
 0x521   :  { %1817 = vsyncpa [#allocation4 + $0x1], 1 }

</bundles_post_ra>
